<compile_context>
chip_gen: v5e
topology: v5e:2x2
jax: 0.10.0
libtpu: 0.0.40
codegen_flags: <defaults>
</compile_context>

<pallas_src>
import numpy as np

import jax
import jax.numpy as jnp
from jax.experimental import pallas as pl
from jax.experimental.pallas import tpu as pltpu


def _round_up(x, m):
    return (x + m - 1) // m * m


def conv_shape(input_size, filter_size, stride, padding=0):
    return 1 + (input_size - filter_size + 2 * padding) // stride


# ----------------------------------------------------------------------------
# Parameters in PyTorch layout
# ----------------------------------------------------------------------------
def init_dqn_params(key, input_channels, input_size, output_size):
    c1 = conv_shape(input_size, 4, 4)
    c2 = conv_shape(c1, 4, 2)
    c3 = conv_shape(c2, 3, 1)
    flat = c3 * c3 * 64

    keys = jax.random.split(key, 10)

    def w(k, shape, fan_in):
        return (jax.random.normal(k, shape, jnp.float32) / jnp.sqrt(fan_in)).astype(jnp.float32)

    return {
        "conv1_w": w(keys[0], (32, input_channels, 4, 4), input_channels * 16),
        "conv1_b": 0.01 * jax.random.normal(keys[1], (32,), jnp.float32),
        "conv2_w": w(keys[2], (64, 32, 4, 4), 32 * 16),
        "conv2_b": 0.01 * jax.random.normal(keys[3], (64,), jnp.float32),
        "conv3_w": w(keys[4], (64, 64, 3, 3), 64 * 9),
        "conv3_b": 0.01 * jax.random.normal(keys[5], (64,), jnp.float32),
        "lin1_w": w(keys[6], (512, flat), flat),
        "lin1_b": 0.01 * jax.random.normal(keys[7], (512,), jnp.float32),
        "lin2_w": w(keys[8], (output_size, 512), 512),
        "lin2_b": 0.01 * jax.random.normal(keys[9], (output_size,), jnp.float32),
    }


# ----------------------------------------------------------------------------
# Fused forward builder
# ----------------------------------------------------------------------------
def build_fused_dqn(params, input_channels, input_size, output_size, batch,
                    block_batch=2):
    """Pre-build (once) the batch-independent constant matrices and return a
    jitted forward(x) running the whole network in one gridded Pallas kernel.

    Per grid step we process `block_batch` images; raise block_batch (e.g.
    16-48) for throughput so the compute matmuls reach M >= 128 rows; the
    constant matrices scale only with block_batch, never with total batch."""
    C = input_channels
    oh1 = conv_shape(input_size, 4, 4)
    oh2 = conv_shape(oh1, 4, 2)
    oh3 = conv_shape(oh2, 3, 1)
    assert oh1 >= 4 and oh2 >= 3 and oh3 >= 1, "input_size too small for DQN"
    K2, K3 = 4, 3                      # conv2 / conv3 kernel heights

    bb = block_batch
    assert batch % bb == 0, "batch must be a multiple of block_batch"
    num_blocks = batch // bb

    rows1 = bb * oh1                   # valid h1 rows per block
    assert rows1 % 16 == 0, "pick block_batch so block_batch*oh1 % 16 == 0"
    r2blk = _round_up(bb * oh2, 16)    # h2 rows per block (padded)
    r3blk = _round_up(bb * oh3, 16)    # h3 rows per block (padded)
    npad = _round_up(bb, 16)           # h4 / output rows per block (padded)

    p1_cols = oh1 * C * 16                       # conv1 im2col width (exact)
    col1p = _round_up(oh1 * 32, 128)             # h1 width (lane-padded)
    col2p = _round_up(oh2 * 64, 128)             # h2 width
    col3p = _round_up(oh3 * 64, 128)             # h3 width
    outp = _round_up(max(output_size, 128), 128)  # lane-dense output width

    w1 = np.asarray(params["conv1_w"], np.float32)   # (32, C, 4, 4)
    w2 = np.asarray(params["conv2_w"], np.float32)   # (64, 32, 4, 4)
    w3 = np.asarray(params["conv3_w"], np.float32)   # (64, 64, 3, 3)
    wl1 = np.asarray(params["lin1_w"], np.float32)   # (512, 64*oh3*oh3)
    wl2 = np.asarray(params["lin2_w"], np.float32)   # (out, 512)

    # ---- conv1: block-diagonal matmul weight (kernel == stride == 4) -------
    bd1 = np.zeros((p1_cols, col1p), np.float32)
    for b in range(oh1):
        for c in range(C):
            for di in range(4):
                for dj in range(4):
                    row = b * (C * 16) + c * 16 + di * 4 + dj
                    bd1[row, b * 32:(b + 1) * 32] = w1[:, c, di, dj]

    # ---- conv2: row-gather L2 (stride 2) + block-banded column matrix R2 ---
    l2 = np.zeros((K2 * r2blk, rows1), np.float32)
    for di in range(K2):
        for n in range(bb):
            for a2 in range(oh2):
                l2[di * r2blk + n * oh2 + a2, n * oh1 + 2 * a2 + di] = 1.0
    r2m = np.zeros((K2 * col1p, col2p), np.float32)
    for di in range(K2):
        for b1 in range(oh1):
            for c in range(32):
                row = di * col1p + b1 * 32 + c
                for b2 in range(oh2):
                    dj = b1 - 2 * b2
                    if 0 <= dj < 4:
                        r2m[row, b2 * 64:(b2 + 1) * 64] = w2[:, c, di, dj]

    # ---- conv3: row-gather L3 (stride 1) + block-banded R3 ------------------
    l3 = np.zeros((K3 * r3blk, r2blk), np.float32)
    for di in range(K3):
        for n in range(bb):
            for a3 in range(oh3):
                l3[di * r3blk + n * oh3 + a3, n * oh2 + a3 + di] = 1.0
    r3m = np.zeros((K3 * col2p, col3p), np.float32)
    for di in range(K3):
        for b2 in range(oh2):
            for c in range(64):
                row = di * col2p + b2 * 64 + c
                for b3 in range(oh3):
                    dj = b2 - b3
                    if 0 <= dj < 3:
                        r3m[row, b3 * 64:(b3 + 1) * 64] = w3[:, c, di, dj]

    # ---- linear1: gather (n, h3) -> n, PyTorch NCHW flatten folded into R4 --
    l4 = np.zeros((oh3 * npad, r3blk), np.float32)
    for h3 in range(oh3):
        for n in range(bb):
            l4[h3 * npad + n, n * oh3 + h3] = 1.0
    r4m = np.zeros((oh3 * col3p, 512), np.float32)
    for h3 in range(oh3):
        for w3_ in range(oh3):
            for c in range(64):
                row = h3 * col3p + w3_ * 64 + c
                flat = c * oh3 * oh3 + h3 * oh3 + w3_
                r4m[row, :] = wl1[:, flat]

    # ---- linear2 -------------------------------------------------------------
    r5m = np.zeros((512, outp), np.float32)
    r5m[:, :output_size] = wl2.T

    # ---- pack all constant matrices into ONE bf16 blob (3 operands total) ----
    mats = [bd1, l2, r2m, l3, r3m, l4, r4m, r5m]
    blob_w = _round_up(max(m.shape[1] for m in mats), 128)
    offs, rows_total = [], 0
    for m in mats:
        offs.append(rows_total)
        rows_total += m.shape[0]           # every row count is a multiple of 16
    blob_np = np.zeros((rows_total, blob_w), np.float32)
    for m, o in zip(mats, offs):
        blob_np[o:o + m.shape[0], :m.shape[1]] = m
    (o_bd1, o_l2, o_r2, o_l3, o_r3, o_l4, o_r4, o_r5) = offs
    blob = jnp.asarray(blob_np, jnp.bfloat16)

    # ---- biases: one small f32 buffer (f32 epilogues, padded lanes = 0) ------
    bias_w = max(col1p, col2p, col3p, 512, outp)
    bias_np = np.zeros((8, bias_w), np.float32)
    b1, b2, b3 = (np.asarray(params[k], np.float32)
                  for k in ("conv1_b", "conv2_b", "conv3_b"))
    for b in range(oh1):
        bias_np[0, b * 32:(b + 1) * 32] = b1
    for b in range(oh2):
        bias_np[1, b * 64:(b + 1) * 64] = b2
    for b in range(oh3):
        bias_np[2, b * 64:(b + 1) * 64] = b3
    bias_np[3, :512] = np.asarray(params["lin1_b"], np.float32)
    bias_np[4, :output_size] = np.asarray(params["lin2_b"], np.float32)
    biases = jnp.asarray(bias_np, jnp.float32)

    # ------------------------------------------------------------------------
    # The fused kernel (one grid step == one block of `bb` images)
    # ------------------------------------------------------------------------
    def kernel(p1_ref, w_ref, b_ref, o_ref):
        bf16 = jnp.bfloat16
        f32 = jnp.float32

        def mm(a, b):
            return jnp.dot(a, b, preferred_element_type=f32)

        def widen(g, nblk, rblk):
            # (nblk*rblk, w) row blocks -> (rblk, nblk*w); row offsets are
            # multiples of 16 and widths multiples of 128, so the lane concat
            # is pure vreg placement. Single bf16 cast after the gather.
            parts = [g[j * rblk:(j + 1) * rblk, :] for j in range(nblk)]
            cat = parts[0] if nblk == 1 else jnp.concatenate(parts, axis=1)
            return cat.astype(bf16)

        # conv1: ONE block-diagonal matmul (K = oh1*C*16).
        h1 = mm(p1_ref[...], w_ref[o_bd1:o_bd1 + p1_cols, :col1p])
        h1 = jnp.maximum(h1 + b_ref[0:1, :col1p], 0.0).astype(bf16)

        # conv2: 1 row-gather matmul + 1 K-merged compute matmul (K = 4*col1p).
        g2 = widen(mm(w_ref[o_l2:o_l2 + K2 * r2blk, :rows1], h1), K2, r2blk)
        h2 = mm(g2, w_ref[o_r2:o_r2 + K2 * col1p, :col2p])
        h2 = jnp.maximum(h2 + b_ref[1:2, :col2p], 0.0).astype(bf16)
        # rows >= bb*oh2 of h2 hold relu(bias) garbage; L3 has zero columns there.

        # conv3: 1 gather + 1 compute matmul (K = 3*col2p).
        g3 = widen(mm(w_ref[o_l3:o_l3 + K3 * r3blk, :r2blk], h2), K3, r3blk)
        h3 = mm(g3, w_ref[o_r3:o_r3 + K3 * col2p, :col3p])
        h3 = jnp.maximum(h3 + b_ref[2:3, :col3p], 0.0).astype(bf16)

        # linear1: gather (n, h3) -> n, then ONE matmul (flatten folded in R4).
        g4 = widen(mm(w_ref[o_l4:o_l4 + oh3 * npad, :r3blk], h3), oh3, npad)
        h4 = mm(g4, w_ref[o_r4:o_r4 + oh3 * col3p, :512])
        h4 = jnp.maximum(h4 + b_ref[3:4, :512], 0.0).astype(bf16)

        # linear2 epilogue -> full lane-dense (npad, outp) f32 tile.
        o_ref[...] = mm(h4, w_ref[o_r5:o_r5 + 512, :outp]) + b_ref[4:5, :outp]

    fused = pl.pallas_call(
        kernel,
        out_shape=jax.ShapeDtypeStruct((num_blocks * npad, outp), jnp.float32),
        grid_spec=pltpu.PrefetchScalarGridSpec(
            num_scalar_prefetch=0,
            grid=(num_blocks,),
            in_specs=[
                pl.BlockSpec((rows1, p1_cols), lambda i: (i, 0)),       # activations
                pl.BlockSpec((rows_total, blob_w), lambda i: (0, 0)),   # weight blob
                pl.BlockSpec((8, bias_w), lambda i: (0, 0)),            # biases
            ],
            out_specs=pl.BlockSpec((npad, outp), lambda i: (i, 0)),
        ),
        compiler_params=pltpu.CompilerParams(
            dimension_semantics=("parallel",),
            vmem_limit_bytes=32 * 1024 * 1024,
        ),
    )

    def forward(x):
        n, c, _, _ = x.shape
        assert n == batch and c == C
        # conv1 has kernel == stride == 4 -> im2col is an exact reshape of the
        # tiny NCHW input; cast to bf16 here so the per-call DMA is half-size.
        # Rows = (image, out_row); cols = (out_col, cin, kh, kw) to match BD1.
        xs = x[:, :, :oh1 * 4, :oh1 * 4]
        p1 = xs.reshape(n, C, oh1, 4, oh1, 4).transpose(0, 2, 4, 1, 3, 5)
        p1 = p1.reshape(n * oh1, p1_cols).astype(jnp.bfloat16)
        out = fused(p1, blob, biases)
        out = out.reshape(num_blocks, npad, outp)[:, :bb, :output_size]
        return out.reshape(batch, output_size)

    return jax.jit(forward)


# ----------------------------------------------------------------------------
# Pure-JAX reference (ground truth, f32 highest precision)
# ----------------------------------------------------------------------------
def dqn_forward_ref(params, x):
    def conv(x, w, b, s):
        y = jax.lax.conv_general_dilated(
            x, w, window_strides=(s, s), padding="VALID",
            dimension_numbers=("NCHW", "OIHW", "NCHW"),
            precision=jax.lax.Precision.HIGHEST,
        )
        return jax.nn.relu(y + b[None, :, None, None])

    x = conv(x, params["conv1_w"], params["conv1_b"], 4)
    x = conv(x, params["conv2_w"], params["conv2_b"], 2)
    x = conv(x, params["conv3_w"], params["conv3_b"], 1)
    x = x.reshape(x.shape[0], -1)
    x = jax.nn.relu(
        jnp.dot(x, params["lin1_w"].T, precision=jax.lax.Precision.HIGHEST)
        + params["lin1_b"]
    )
    return (
        jnp.dot(x, params["lin2_w"].T, precision=jax.lax.Precision.HIGHEST)
        + params["lin2_b"]
    )


if __name__ == "__main__":
    batch = 4
    input_channels = 4
    input_size = 32   # 32 -> conv1(4,4): 8 -> conv2(4,2): 3 -> conv3(3,1): 1
    output_size = 6

    key = jax.random.PRNGKey(0)
    pkey, xkey = jax.random.split(key)
    params = init_dqn_params(pkey, input_channels, input_size, output_size)
    x = jax.random.normal(xkey, (batch, input_channels, input_size, input_size),
                          jnp.float32)

    forward = build_fused_dqn(params, input_channels, input_size, output_size,
                              batch, block_batch=2)
    out = jax.block_until_ready(forward(x))
    ref = jax.block_until_ready(dqn_forward_ref(params, x))

    assert out.shape == (batch, output_size), out.shape
    max_err = float(jnp.max(jnp.abs(out - ref)))
    # bf16 single-pass MXU vs f32-highest reference -> loose tolerance
    # (documented precision contract: Q-values to ~1e-2 absolute).
    assert jnp.allclose(out, ref, rtol=5e-2, atol=5e-2), ("mismatch vs reference", max_err)

    print("KERNEL_OK")
</pallas_src>

<mosaic_0001>
module attributes {stable_mosaic.version = 11 : i64} {
  func.func @kernel(%arg0: i32, %arg1: memref<16x512xbf16, #tpu.memory_space<vmem>>, %arg2: memref<3072x512xbf16, #tpu.memory_space<vmem>>, %arg3: memref<8x512xf32, #tpu.memory_space<vmem>>, %arg4: memref<16x128xf32, #tpu.memory_space<vmem>>) attributes {dimension_semantics = [#tpu.dimension_semantics<parallel>], iteration_bounds = array<i64: 2>, scalar_prefetch = 0 : i64, scratch_operands = 0 : i64, tpu.core_type = #tpu.core_type<tc>, window_params = [{transform_indices = @transform_0, window_bounds = array<i64: 16, 512>}, {pipeline_mode = #tpu.pipeline_mode<synchronous>, transform_indices = @transform_1, window_bounds = array<i64: 3072, 512>}, {pipeline_mode = #tpu.pipeline_mode<synchronous>, transform_indices = @transform_2, window_bounds = array<i64: 8, 512>}, {transform_indices = @transform_3, window_bounds = array<i64: 16, 128>}]} {
    %c0 = arith.constant 0 : index
    %c0_0 = arith.constant 0 : index
    %0 = vector.load %arg1[%c0, %c0_0] : memref<16x512xbf16, #tpu.memory_space<vmem>>, vector<16x512xbf16>
    %c0_1 = arith.constant 0 : index
    %c0_2 = arith.constant 0 : index
    %1 = vector.load %arg2[%c0_1, %c0_2] : memref<3072x512xbf16, #tpu.memory_space<vmem>>, vector<512x256xbf16>
    %cst = arith.constant dense<0.000000e+00> : vector<16x256xf32>
    %2 = tpu.matmul %0, %1, %cst {dimension_numbers = #tpu.dot_dimension_numbers<[1], [0], [0], [1], [0, 0, 1, 1], [], []>} : vector<16x512xbf16>, vector<512x256xbf16>, vector<16x256xf32> -> vector<16x256xf32>
    %c0_3 = arith.constant 0 : index
    %c0_4 = arith.constant 0 : index
    %3 = vector.load %arg3[%c0_3, %c0_4] : memref<8x512xf32, #tpu.memory_space<vmem>>, vector<1x256xf32>
    %4 = vector.broadcast %3 : vector<1x256xf32> to vector<16x256xf32>
    %5 = arith.addf %2, %4 : vector<16x256xf32>
    %cst_5 = arith.constant 0.000000e+00 : f32
    %6 = vector.broadcast %cst_5 : f32 to vector<16x256xf32>
    %7 = arith.maximumf %5, %6 : vector<16x256xf32>
    %8 = arith.truncf %7 : vector<16x256xf32> to vector<16x256xbf16>
    %c512 = arith.constant 512 : index
    %c0_6 = arith.constant 0 : index
    %9 = vector.load %arg2[%c512, %c0_6] : memref<3072x512xbf16, #tpu.memory_space<vmem>>, vector<64x16xbf16>
    %cst_7 = arith.constant dense<0.000000e+00> : vector<64x256xf32>
    %10 = tpu.matmul %9, %8, %cst_7 {dimension_numbers = #tpu.dot_dimension_numbers<[1], [0], [0], [1], [0, 0, 1, 1], [], []>} : vector<64x16xbf16>, vector<16x256xbf16>, vector<64x256xf32> -> vector<64x256xf32>
    %11 = vector.extract_strided_slice %10 {offsets = [0, 0], sizes = [16, 256], strides = [1, 1]} : vector<64x256xf32> to vector<16x256xf32>
    %12 = vector.extract_strided_slice %10 {offsets = [16, 0], sizes = [16, 256], strides = [1, 1]} : vector<64x256xf32> to vector<16x256xf32>
    %13 = vector.extract_strided_slice %10 {offsets = [32, 0], sizes = [16, 256], strides = [1, 1]} : vector<64x256xf32> to vector<16x256xf32>
    %14 = vector.extract_strided_slice %10 {offsets = [48, 0], sizes = [16, 256], strides = [1, 1]} : vector<64x256xf32> to vector<16x256xf32>
    %15 = tpu.concatenate %11, %12, %13, %14 in 1 : vector<16x256xf32>, vector<16x256xf32>, vector<16x256xf32>, vector<16x256xf32> -> vector<16x1024xf32>
    %16 = arith.truncf %15 : vector<16x1024xf32> to vector<16x1024xbf16>
    %c576 = arith.constant 576 : index
    %c0_8 = arith.constant 0 : index
    %17 = vector.load %arg2[%c576, %c0_8] : memref<3072x512xbf16, #tpu.memory_space<vmem>>, vector<1024x256xbf16>
    %cst_9 = arith.constant dense<0.000000e+00> : vector<16x256xf32>
    %18 = tpu.matmul %16, %17, %cst_9 {dimension_numbers = #tpu.dot_dimension_numbers<[1], [0], [0], [1], [0, 0, 1, 1], [], []>} : vector<16x1024xbf16>, vector<1024x256xbf16>, vector<16x256xf32> -> vector<16x256xf32>
    %c1 = arith.constant 1 : index
    %c0_10 = arith.constant 0 : index
    %19 = vector.load %arg3[%c1, %c0_10] : memref<8x512xf32, #tpu.memory_space<vmem>>, vector<1x256xf32>
    %20 = vector.broadcast %19 : vector<1x256xf32> to vector<16x256xf32>
    %21 = arith.addf %18, %20 : vector<16x256xf32>
    %cst_11 = arith.constant 0.000000e+00 : f32
    %22 = vector.broadcast %cst_11 : f32 to vector<16x256xf32>
    %23 = arith.maximumf %21, %22 : vector<16x256xf32>
    %24 = arith.truncf %23 : vector<16x256xf32> to vector<16x256xbf16>
    %c1600 = arith.constant 1600 : index
    %c0_12 = arith.constant 0 : index
    %25 = vector.load %arg2[%c1600, %c0_12] : memref<3072x512xbf16, #tpu.memory_space<vmem>>, vector<48x16xbf16>
    %cst_13 = arith.constant dense<0.000000e+00> : vector<48x256xf32>
    %26 = tpu.matmul %25, %24, %cst_13 {dimension_numbers = #tpu.dot_dimension_numbers<[1], [0], [0], [1], [0, 0, 1, 1], [], []>} : vector<48x16xbf16>, vector<16x256xbf16>, vector<48x256xf32> -> vector<48x256xf32>
    %27 = vector.extract_strided_slice %26 {offsets = [0, 0], sizes = [16, 256], strides = [1, 1]} : vector<48x256xf32> to vector<16x256xf32>
    %28 = vector.extract_strided_slice %26 {offsets = [16, 0], sizes = [16, 256], strides = [1, 1]} : vector<48x256xf32> to vector<16x256xf32>
    %29 = vector.extract_strided_slice %26 {offsets = [32, 0], sizes = [16, 256], strides = [1, 1]} : vector<48x256xf32> to vector<16x256xf32>
    %30 = tpu.concatenate %27, %28, %29 in 1 : vector<16x256xf32>, vector<16x256xf32>, vector<16x256xf32> -> vector<16x768xf32>
    %31 = arith.truncf %30 : vector<16x768xf32> to vector<16x768xbf16>
    %c1648 = arith.constant 1648 : index
    %c0_14 = arith.constant 0 : index
    %32 = vector.load %arg2[%c1648, %c0_14] : memref<3072x512xbf16, #tpu.memory_space<vmem>>, vector<768x128xbf16>
    %cst_15 = arith.constant dense<0.000000e+00> : vector<16x128xf32>
    %33 = tpu.matmul %31, %32, %cst_15 {dimension_numbers = #tpu.dot_dimension_numbers<[1], [0], [0], [1], [0, 0, 1, 1], [], []>} : vector<16x768xbf16>, vector<768x128xbf16>, vector<16x128xf32> -> vector<16x128xf32>
    %c2 = arith.constant 2 : index
    %c0_16 = arith.constant 0 : index
    %34 = vector.load %arg3[%c2, %c0_16] : memref<8x512xf32, #tpu.memory_space<vmem>>, vector<1x128xf32>
    %35 = vector.broadcast %34 : vector<1x128xf32> to vector<16x128xf32>
    %36 = arith.addf %33, %35 : vector<16x128xf32>
    %cst_17 = arith.constant 0.000000e+00 : f32
    %37 = vector.broadcast %cst_17 : f32 to vector<16x128xf32>
    %38 = arith.maximumf %36, %37 : vector<16x128xf32>
    %39 = arith.truncf %38 : vector<16x128xf32> to vector<16x128xbf16>
    %c2416 = arith.constant 2416 : index
    %c0_18 = arith.constant 0 : index
    %40 = vector.load %arg2[%c2416, %c0_18] : memref<3072x512xbf16, #tpu.memory_space<vmem>>, vector<16x16xbf16>
    %cst_19 = arith.constant dense<0.000000e+00> : vector<16x128xf32>
    %41 = tpu.matmul %40, %39, %cst_19 {dimension_numbers = #tpu.dot_dimension_numbers<[1], [0], [0], [1], [0, 0, 1, 1], [], []>} : vector<16x16xbf16>, vector<16x128xbf16>, vector<16x128xf32> -> vector<16x128xf32>
    %42 = arith.truncf %41 : vector<16x128xf32> to vector<16x128xbf16>
    %c2432 = arith.constant 2432 : index
    %c0_20 = arith.constant 0 : index
    %43 = vector.load %arg2[%c2432, %c0_20] : memref<3072x512xbf16, #tpu.memory_space<vmem>>, vector<128x512xbf16>
    %cst_21 = arith.constant dense<0.000000e+00> : vector<16x512xf32>
    %44 = tpu.matmul %42, %43, %cst_21 {dimension_numbers = #tpu.dot_dimension_numbers<[1], [0], [0], [1], [0, 0, 1, 1], [], []>} : vector<16x128xbf16>, vector<128x512xbf16>, vector<16x512xf32> -> vector<16x512xf32>
    %c3 = arith.constant 3 : index
    %c0_22 = arith.constant 0 : index
    %45 = vector.load %arg3[%c3, %c0_22] : memref<8x512xf32, #tpu.memory_space<vmem>>, vector<1x512xf32>
    %46 = vector.broadcast %45 : vector<1x512xf32> to vector<16x512xf32>
    %47 = arith.addf %44, %46 : vector<16x512xf32>
    %cst_23 = arith.constant 0.000000e+00 : f32
    %48 = vector.broadcast %cst_23 : f32 to vector<16x512xf32>
    %49 = arith.maximumf %47, %48 : vector<16x512xf32>
    %50 = arith.truncf %49 : vector<16x512xf32> to vector<16x512xbf16>
    %c2560 = arith.constant 2560 : index
    %c0_24 = arith.constant 0 : index
    %51 = vector.load %arg2[%c2560, %c0_24] : memref<3072x512xbf16, #tpu.memory_space<vmem>>, vector<512x128xbf16>
    %cst_25 = arith.constant dense<0.000000e+00> : vector<16x128xf32>
    %52 = tpu.matmul %50, %51, %cst_25 {dimension_numbers = #tpu.dot_dimension_numbers<[1], [0], [0], [1], [0, 0, 1, 1], [], []>} : vector<16x512xbf16>, vector<512x128xbf16>, vector<16x128xf32> -> vector<16x128xf32>
    %c4 = arith.constant 4 : index
    %c0_26 = arith.constant 0 : index
    %53 = vector.load %arg3[%c4, %c0_26] : memref<8x512xf32, #tpu.memory_space<vmem>>, vector<1x128xf32>
    %54 = vector.broadcast %53 : vector<1x128xf32> to vector<16x128xf32>
    %55 = arith.addf %52, %54 : vector<16x128xf32>
    %c0_27 = arith.constant 0 : index
    %c0_28 = arith.constant 0 : index
    %56 = vector.load %arg4[%c0_27, %c0_28] : memref<16x128xf32, #tpu.memory_space<vmem>>, vector<16x128xf32>
    tpu.vector_store %arg4[%c0_27, %c0_28], %55 {strides = array<i32>} : memref<16x128xf32, #tpu.memory_space<vmem>>, vector<16x128xf32>,
    return
  }
  func.func @transform_0(%arg0: i32) -> (i32, i32) {
    %c0_i32 = arith.constant 0 : i32
    %c0_i32_0 = arith.constant 0 : i32
    return %arg0, %c0_i32 : i32, i32
  }
  func.func @transform_1(%arg0: i32) -> (i32, i32) {
    %c0_i32 = arith.constant 0 : i32
    %c0_i32_0 = arith.constant 0 : i32
    %c0_i32_1 = arith.constant 0 : i32
    return %c0_i32, %c0_i32_0 : i32, i32
  }
  func.func @transform_2(%arg0: i32) -> (i32, i32) {
    %c0_i32 = arith.constant 0 : i32
    %c0_i32_0 = arith.constant 0 : i32
    %c0_i32_1 = arith.constant 0 : i32
    return %c0_i32, %c0_i32_0 : i32, i32
  }
  func.func @transform_3(%arg0: i32) -> (i32, i32) {
    %c0_i32 = arith.constant 0 : i32
    %c0_i32_0 = arith.constant 0 : i32
    return %arg0, %c0_i32 : i32, i32
  }
}

</mosaic_0001>

<bundles_post_ra>
// kernel: forward.1
= control target key start
LH: loop header
LB: loop body
LE: loop exit
PB: predicated region body
PF: predicated region fallthrough
CT: control target
= control target key end

     0   :  { %s4691_s12 = smov 0   ;;  %s6668_s0 = inlined_call_operand.vmem [shape: bf16[32,512], index: 0, kind: input, shape index: {}]   ;;  %s6669_s1 = inlined_call_operand.vmem [shape: bf16[3072,512], index: 1, kind: input, shape index: {}]   ;;  %s6670_s2 = inlined_call_operand.vmem [shape: f32[8,512], index: 2, kind: input, shape index: {}]   ;;  %s6671_s3 = inlined_call_operand.vmem [shape: f32[32,128], index: 3, kind: output, shape index: {}]  }
   0x1 LB: > { %s3045_s13 = sadd.s32 4294967295, %s4669_s12   ;;  %p3049_p0 = scmp.ge.s32.totalorder %s4669_s12, 1  ;;  %s4669_s12 = sphi %s4691_s12, %s13_s12  }
   0x2   : > { %p139_p1 = scmp.lt.s32.totalorder %s4669_s12, 3 }
   0x4   : > { %p140_p2 = pnand %p3049_p0, %p139_p1 }
   0x5   : > { %s3050_s17 = sshll.u32 (!%p140_p2), %s3045_s13, 1 }
   0x6   : > { %143 = sbr.rel (%p140_p2) target bundleno = 1356 (0x54c), region = 32  ;;  %p165_p3 = scmp.lt.s32.totalorder (!%p140_p2), %s3050_s17, 3 }
   0xb   : > { %v3129_v0 = vld [vmem:[%s6669_s1 + $0xe0] sm:$0xf]  ;;  %v4358_v1 = vld [vmem:[%s6669_s1 + $0xec] sm:$0xf0]  ;;  %s6673_s17 = smov (!%p165_p3, %s3050_s17), 3  ;;  %vm738_vm0 = vcmask 130048  }
   0xc   : > { %v3193_v2 = vld [vmem:[%s6669_s1 + $0x1e0] sm:$0xf]  ;;  %v3130_v3 = vor.u32 %v4358_v1, %v3129_v0  ;;  %v4374_v4 = vld [vmem:[%s6669_s1 + $0x1ec] sm:$0xf0]  ;;  %s4338_s10 = sshll.u32 %s6673_s17, 4  ;;  %s3054_s26 = sshll.u32 %s6673_s17, 3 }
   0xd   : > { %v3257_v5 = vld [vmem:[%s6669_s1 + $0x2e0] sm:$0xf]  ;;  %v4390_v6 = vld [vmem:[%s6669_s1 + $0x2ec] sm:$0xf0]  ;;  %v3194_v7 = vor.u32 %v4374_v4, %v3193_v2  ;;  %s169_s22 = scalar_lea.vmem %s6668_s0, %s4338_s10  ;;  %s175_s29 = scalar_lea.vmem %s6671_s3, %s3054_s26 }
   0xe   : > { %v3258_v8 = vor.u32 %v4390_v6, %v3257_v5  ;;  %v3321_v9 = vld [vmem:[%s6669_s1 + $0x3e0] sm:$0xf]  ;;  %v4406_v10 = vld [vmem:[%s6669_s1 + $0x3ec] sm:$0xf0]  ;;  %592 = vmatpush.bf16.msra.mxu0 %v3130_v3 }
   0xf   : > { %v3121_v11 = vld [vmem:[%s6669_s1 + $0xc0] sm:$0xf]  ;;  %v3322_v12 = vor.u32 %v4406_v10, %v3321_v9  ;;  %v4356_v13 = vld [vmem:[%s6669_s1 + $0xcc] sm:$0xf0]  ;;  %606 = vmatpush.bf16.msra.mxu1 %v3194_v7 }
  0x10   : > { %v3185_v14 = vld [vmem:[%s6669_s1 + $0x1c0] sm:$0xf]  ;;  %v4372_v15 = vld [vmem:[%s6669_s1 + $0x1cc] sm:$0xf0]  ;;  %620 = vmatpush.bf16.msra.mxu2 %v3258_v8  ;;  %v3122_v16 = vor.u32 %v4356_v13, %v3121_v11 }
  0x11   : > { %v3186_v17 = vor.u32 %v4372_v15, %v3185_v14  ;;  %v3249_v18 = vld [vmem:[%s6669_s1 + $0x2c0] sm:$0xf]  ;;  %v4388_v19 = vld [vmem:[%s6669_s1 + $0x2cc] sm:$0xf0]  ;;  %634 = vmatpush.bf16.msra.mxu3 %v3322_v12 }
  0x12   : > { %v3313_v20 = vld [vmem:[%s6669_s1 + $0x3c0] sm:$0xf]  ;;  %v3250_v21 = vor.u32 %v4388_v19, %v3249_v18  ;;  %v4404_v22 = vld [vmem:[%s6669_s1 + $0x3cc] sm:$0xf0]  ;;  %593 = vmatpush.bf16.msra.mxu0 %v3122_v16 }
  0x13   : > { %v3113_v23 = vld [vmem:[%s6669_s1 + $0xa0] sm:$0xf]  ;;  %v4354_v24 = vld [vmem:[%s6669_s1 + $0xac] sm:$0xf0]  ;;  %v3314_v25 = vor.u32 %v4404_v22, %v3313_v20  ;;  %607 = vmatpush.bf16.msra.mxu1 %v3186_v17 }
  0x14   : > { %v3177_v26 = vld [vmem:[%s6669_s1 + $0x1a0] sm:$0xf]  ;;  %v4370_v27 = vld [vmem:[%s6669_s1 + $0x1ac] sm:$0xf0]  ;;  %v3114_v29 = vor.u32 %v4354_v24, %v3113_v23  ;;  %621 = vmatpush.bf16.msra.mxu2 %v3250_v21 }
  0x15   : > { %v3241_v28 = vld [vmem:[%s6669_s1 + $0x2a0] sm:$0xf]  ;;  %v4386_v30 = vld [vmem:[%s6669_s1 + $0x2ac] sm:$0xf0]  ;;  %v3178_v33 = vor.u32 %v4370_v27, %v3177_v26  ;;  %635 = vmatpush.bf16.msra.mxu3 %v3314_v25 }
  0x16   : > { %v3305_v31 = vld [vmem:[%s6669_s1 + $0x3a0] sm:$0xf]  ;;  %v4402_v32 = vld [vmem:[%s6669_s1 + $0x3ac] sm:$0xf0]  ;;  %v3242_v34 = vor.u32 %v4386_v30, %v3241_v28  ;;  %594 = vmatpush.bf16.msra.mxu0 %v3114_v29  ;;  %v4357_v28 = vld [vmem:[%s6669_s1 + $0xe4] sm:$0xf] }
  0x17   : > { %v3105_v35 = vld [vmem:[%s6669_s1 + $0x80] sm:$0xf]  ;;  %v4352_v36 = vld [vmem:[%s6669_s1 + $0x8c] sm:$0xf0]  ;;  %v3306_v38 = vor.u32 %v4402_v32, %v3305_v31  ;;  %608 = vmatpush.bf16.msra.mxu1 %v3178_v33  ;;  %v3131_v29 = vld [vmem:[%s6669_s1 + $0xf0] sm:$0xf0] }
  0x18   : > { %v3169_v37 = vld [vmem:[%s6669_s1 + $0x180] sm:$0xf]  ;;  %v4368_v39 = vld [vmem:[%s6669_s1 + $0x18c] sm:$0xf0]  ;;  %v3106_v44 = vor.u32 %v4352_v36, %v3105_v35  ;;  %622 = vmatpush.bf16.msra.mxu2 %v3242_v34  ;;  %v4373_v30 = vld [vmem:[%s6669_s1 + $0x1e4] sm:$0xf] }
  0x19   : > { %v3233_v40 = vld [vmem:[%s6669_s1 + $0x280] sm:$0xf]  ;;  %v4384_v41 = vld [vmem:[%s6669_s1 + $0x28c] sm:$0xf0]  ;;  %v3170_v45 = vor.u32 %v4368_v39, %v3169_v37  ;;  %636 = vmatpush.bf16.msra.mxu3 %v3306_v38  ;;  %v3195_v31 = vld [vmem:[%s6669_s1 + $0x1f0] sm:$0xf0] }
  0x1a   : > { %v3297_v42 = vld [vmem:[%s6669_s1 + $0x380] sm:$0xf]  ;;  %v4400_v43 = vld [vmem:[%s6669_s1 + $0x38c] sm:$0xf0]  ;;  %v3234_v46 = vor.u32 %v4384_v41, %v3233_v40  ;;  %595 = vmatpush.bf16.msra.mxu0 %v3106_v44  ;;  %v4389_v32 = vld [vmem:[%s6669_s1 + $0x2e4] sm:$0xf] }
  0x1b   : > { %v3097_v47 = vld [vmem:[%s6669_s1 + $0x60] sm:$0xf]  ;;  %v4350_v48 = vld [vmem:[%s6669_s1 + $0x6c] sm:$0xf0]  ;;  %v3298_v50 = vor.u32 %v4400_v43, %v3297_v42  ;;  %609 = vmatpush.bf16.msra.mxu1 %v3170_v45  ;;  %v3259_v34 = vld [vmem:[%s6669_s1 + $0x2f0] sm:$0xf0]  ;;  %v3134_v42 = vor.u32 %v4357_v28, %v3131_v29 }
  0x1c   : > { %v3161_v49 = vld [vmem:[%s6669_s1 + $0x160] sm:$0xf]  ;;  %v4366_v51 = vld [vmem:[%s6669_s1 + $0x16c] sm:$0xf0]  ;;  %v3098_v56 = vor.u32 %v4350_v48, %v3097_v47  ;;  %623 = vmatpush.bf16.msra.mxu2 %v3234_v46  ;;  %v4405_v35 = vld [vmem:[%s6669_s1 + $0x3e4] sm:$0xf]  ;;  %v3198_v46 = vor.u32 %v4373_v30, %v3195_v31  ;;  %v3262_v47 = vor.u32 %v4389_v32, %v3259_v34 }
  0x1d   : > { %v3225_v52 = vld [vmem:[%s6669_s1 + $0x260] sm:$0xf]  ;;  %v4382_v53 = vld [vmem:[%s6669_s1 + $0x26c] sm:$0xf0]  ;;  %v3162_v57 = vor.u32 %v4366_v51, %v3161_v49  ;;  %637 = vmatpush.bf16.msra.mxu3 %v3298_v50  ;;  %v3323_v38 = vld [vmem:[%s6669_s1 + $0x3f0] sm:$0xf0] }
  0x1e   : > { %v3289_v54 = vld [vmem:[%s6669_s1 + $0x360] sm:$0xf]  ;;  %v4398_v55 = vld [vmem:[%s6669_s1 + $0x36c] sm:$0xf0]  ;;  %v3226_v58 = vor.u32 %v4382_v53, %v3225_v52  ;;  %596 = vmatpush.bf16.msra.mxu0 %v3098_v56  ;;  %v4355_v39 = vld [vmem:[%s6669_s1 + $0xc4] sm:$0xf]  ;;  %v3326_v51 = vor.u32 %v4405_v35, %v3323_v38 }
  0x1f   : > { %v3089_v59 = vld [vmem:[%s6669_s1 + $0x40] sm:$0xf]  ;;  %v4348_v60 = vld [vmem:[%s6669_s1 + $0x4c] sm:$0xf0]  ;;  %v3290_v62 = vor.u32 %v4398_v55, %v3289_v54  ;;  %610 = vmatpush.bf16.msra.mxu1 %v3162_v57  ;;  %v3123_v40 = vld [vmem:[%s6669_s1 + $0xd0] sm:$0xf0] }
  0x20   : > { %v3153_v61 = vld [vmem:[%s6669_s1 + $0x140] sm:$0xf]  ;;  %v4364_v63 = vld [vmem:[%s6669_s1 + $0x14c] sm:$0xf0]  ;;  %v3090_v4 = vor.u32 %v4348_v60, %v3089_v59  ;;  %624 = vmatpush.bf16.msra.mxu2 %v3226_v58  ;;  %v4371_v43 = vld [vmem:[%s6669_s1 + $0x1c4] sm:$0xf] }
  0x21   : > { %v3217_v0 = vld [vmem:[%s6669_s1 + $0x240] sm:$0xf]  ;;  %v4380_v1 = vld [vmem:[%s6669_s1 + $0x24c] sm:$0xf0]  ;;  %v3154_v6 = vor.u32 %v4364_v63, %v3153_v61  ;;  %638 = vmatpush.bf16.msra.mxu3 %v3290_v62  ;;  %v3187_v44 = vld [vmem:[%s6669_s1 + $0x1d0] sm:$0xf0]  ;;  %v3126_v61 = vor.u32 %v4355_v39, %v3123_v40 }
  0x22   : > { %v3281_v2 = vld [vmem:[%s6669_s1 + $0x340] sm:$0xf]  ;;  %v4396_v3 = vld [vmem:[%s6669_s1 + $0x34c] sm:$0xf0]  ;;  %v3218_v7 = vor.u32 %v4380_v1, %v3217_v0  ;;  %597 = vmatpush.bf16.msra.mxu0 %v3090_v4  ;;  %v4387_v45 = vld [vmem:[%s6669_s1 + $0x2c4] sm:$0xf]  ;;  %v3190_v0 = vor.u32 %v4371_v43, %v3187_v44 }
  0x23   : > { %v3081_v5 = vld [vmem:[%s6669_s1 + $0x20] sm:$0xf]  ;;  %v4346_v8 = vld [vmem:[%s6669_s1 + $0x2c] sm:$0xf0]  ;;  %v3282_v11 = vor.u32 %v4396_v3, %v3281_v2  ;;  %611 = vmatpush.bf16.msra.mxu1 %v3154_v6  ;;  %v3251_v48 = vld [vmem:[%s6669_s1 + $0x2d0] sm:$0xf0] }
  0x24   : > { %v3145_v9 = vld [vmem:[%s6669_s1 + $0x120] sm:$0xf]  ;;  %v4362_v10 = vld [vmem:[%s6669_s1 + $0x12c] sm:$0xf0]  ;;  %v3082_v18 = vor.u32 %v4346_v8, %v3081_v5  ;;  %625 = vmatpush.bf16.msra.mxu2 %v3218_v7  ;;  %v4403_v49 = vld [vmem:[%s6669_s1 + $0x3c4] sm:$0xf]  ;;  %v3254_v1 = vor.u32 %v4387_v45, %v3251_v48 }
  0x25   : > { %v3209_v12 = vld [vmem:[%s6669_s1 + $0x220] sm:$0xf]  ;;  %v4378_v13 = vld [vmem:[%s6669_s1 + $0x22c] sm:$0xf0]  ;;  %v3146_v23 = vor.u32 %v4362_v10, %v3145_v9  ;;  %639 = vmatpush.bf16.msra.mxu3 %v3282_v11  ;;  %v3315_v50 = vld [vmem:[%s6669_s1 + $0x3d0] sm:$0xf0] }
  0x26   : > { %v3273_v14 = vld [vmem:[%s6669_s1 + $0x320] sm:$0xf]  ;;  %v4394_v15 = vld [vmem:[%s6669_s1 + $0x32c] sm:$0xf0]  ;;  %v3210_v24 = vor.u32 %v4378_v13, %v3209_v12  ;;  %598 = vmatpush.bf16.msra.mxu0 %v3082_v18  ;;  %v3065_v52 = vld [vmem:[%s169_s22 + $0x8] sm:$0xf]  ;;  %v3318_v6 = vor.u32 %v4403_v49, %v3315_v50 }
  0x27   : > { %v3073_v16 = vld [vmem:[%s6669_s1] sm:$0xf]  ;;  %v4344_v17 = vld [vmem:[%s6669_s1 + $0xc] sm:$0xf0]  ;;  %v3274_v27 = vor.u32 %v4394_v15, %v3273_v14  ;;  %612 = vmatpush.bf16.msra.mxu1 %v3146_v23  ;;  %v4342_v53 = vld [vmem:[%s169_s22 + $0x14] sm:$0xf0] }
  0x28   : > { %v3137_v19 = vld [vmem:[%s6669_s1 + $0x100] sm:$0xf]  ;;  %v4360_v20 = vld [vmem:[%s6669_s1 + $0x10c] sm:$0xf0]  ;;  %v3074_v33 = vor.u32 %v4344_v17, %v3073_v16  ;;  %626 = vmatpush.bf16.msra.mxu2 %v3210_v24  ;;  %v4947_v55 = vor.u32 %v4342_v53, %v3065_v52  ;;  %v4340_v57 = vld [vmem:[%s169_s22 + $0xc] sm:$0xf] }
  0x29   : > { %v3201_v21 = vld [vmem:[%s6669_s1 + $0x200] sm:$0xf]  ;;  %v4376_v22 = vld [vmem:[%s6669_s1 + $0x20c] sm:$0xf0]  ;;  %v3138_v36 = vor.u32 %v4360_v20, %v3137_v19  ;;  %640 = vmatpush.bf16.msra.mxu3 %v3274_v27  ;;  %v3067_v58 = vld [vmem:[%s169_s22 + $0x18] sm:$0xf0] }
  0x2a   : > { %v3265_v25 = vld [vmem:[%s6669_s1 + $0x300] sm:$0xf]  ;;  %v4392_v26 = vld [vmem:[%s6669_s1 + $0x30c] sm:$0xf0]  ;;  %v3202_v37 = vor.u32 %v4376_v22, %v3201_v21  ;;  %599 = vmatpush.bf16.msra.mxu0 %v3074_v33  ;;  %v4951_v60 = vor.u32 %v4340_v57, %v3067_v58  ;;  %v4339_v62 = vld [vmem:[%s169_s22 + $0x4] sm:$0xf] }
  0x2b   : > { %v3266_v41 = vor.u32 %v4392_v26, %v3265_v25  ;;  %v3057_v54 = vld [vmem:[%s169_s22] sm:$0xf]  ;;  %613 = vmatpush.bf16.msra.mxu1 %v3138_v36  ;;  %v4341_v56 = vld [vmem:[%s169_s22 + $0xc] sm:$0xf0]  ;;  %v3059_v63 = vld [vmem:[%s169_s22 + $0x10] sm:$0xf0] }
  0x2c   : > { %627 = vmatpush.bf16.msra.mxu2 %v3202_v37  ;;  %v4949_v59 = vor.u32 %v4341_v56, %v3057_v54  ;;  %v4953_v2 = vor.u32 %v4339_v62, %v3059_v63  ;;  %v4353_v3 = vld [vmem:[%s6669_s1 + $0xa4] sm:$0xf]  ;;  %v3115_v4 = vld [vmem:[%s6669_s1 + $0xb0] sm:$0xf0] }
  0x2d   : > { %641 = vmatpush.bf16.msra.mxu3 %v3266_v41  ;;  %v4369_v5 = vld [vmem:[%s6669_s1 + $0x1a4] sm:$0xf]  ;;  %v3179_v7 = vld [vmem:[%s6669_s1 + $0x1b0] sm:$0xf0]  ;;  %v3118_v12 = vor.u32 %v4353_v3, %v3115_v4 }
  0x2e   : > { %648 = vmatpush.bf16.msrb.mxu0 %v3134_v42  ;;  %v4385_v8 = vld [vmem:[%s6669_s1 + $0x2a4] sm:$0xf]  ;;  %v3243_v9 = vld [vmem:[%s6669_s1 + $0x2b0] sm:$0xf0]  ;;  %614 = vmatmul.bf16.vlgmr.msra.gmra.mxu1 %v4953_v2  ;;  %v3182_v13 = vor.u32 %v4369_v5, %v3179_v7 }
  0x2f   : > { %662 = vmatpush.bf16.msrb.mxu1 %v3198_v46  ;;  %628 = vmatmul.bf16.vlgmr.msra.gmra.mxu2 %v4947_v55  ;;  %v4401_v10 = vld [vmem:[%s6669_s1 + $0x3a4] sm:$0xf]  ;;  %v3307_v11 = vld [vmem:[%s6669_s1 + $0x3b0] sm:$0xf0]  ;;  %v3246_v14 = vor.u32 %v4385_v8, %v3243_v9 }
  0x30   : > { %676 = vmatpush.bf16.msrb.mxu2 %v3262_v47  ;;  %600 = vmatmul.bf16.vlgmr.msra.gmra.mxu0 %v4949_v59  ;;  %v4351_v15 = vld [vmem:[%s6669_s1 + $0x84] sm:$0xf]  ;;  %v3107_v16 = vld [vmem:[%s6669_s1 + $0x90] sm:$0xf0]  ;;  %v3310_v18 = vor.u32 %v4401_v10, %v3307_v11 }
  0x31   : > { %690 = vmatpush.bf16.msrb.mxu3 %v3326_v51  ;;  %v4367_v17 = vld [vmem:[%s6669_s1 + $0x184] sm:$0xf]  ;;  %v3171_v19 = vld [vmem:[%s6669_s1 + $0x190] sm:$0xf0]  ;;  %v3110_v24 = vor.u32 %v4351_v15, %v3107_v16 }
  0x32   : > { %642 = vmatmul.bf16.vlgmr.msra.gmra.mxu3 %v4951_v60  ;;  %649 = vmatpush.bf16.msrb.mxu0 %v3126_v61  ;;  %v4383_v20 = vld [vmem:[%s6669_s1 + $0x284] sm:$0xf]  ;;  %v3235_v21 = vld [vmem:[%s6669_s1 + $0x290] sm:$0xf0]  ;;  %v3174_v25 = vor.u32 %v4367_v17, %v3171_v19 }
  0x33   : > { %663 = vmatpush.bf16.msrb.mxu1 %v3190_v0  ;;  %v4399_v22 = vld [vmem:[%s6669_s1 + $0x384] sm:$0xf]  ;;  %v3299_v23 = vld [vmem:[%s6669_s1 + $0x390] sm:$0xf0]  ;;  %v3238_v26 = vor.u32 %v4383_v20, %v3235_v21 }
  0x34   : > { %677 = vmatpush.bf16.msrb.mxu2 %v3254_v1  ;;  %v4349_v27 = vld [vmem:[%s6669_s1 + $0x64] sm:$0xf]  ;;  %v3099_v28 = vld [vmem:[%s6669_s1 + $0x70] sm:$0xf0]  ;;  %v3302_v30 = vor.u32 %v4399_v22, %v3299_v23 }
  0x35   : > { %691 = vmatpush.bf16.msrb.mxu3 %v3318_v6  ;;  %v4365_v29 = vld [vmem:[%s6669_s1 + $0x164] sm:$0xf]  ;;  %v3163_v31 = vld [vmem:[%s6669_s1 + $0x170] sm:$0xf0]  ;;  %v3102_v36 = vor.u32 %v4349_v27, %v3099_v28 }
  0x36   : > { %650 = vmatpush.bf16.msrb.mxu0 %v3118_v12  ;;  %v4381_v32 = vld [vmem:[%s6669_s1 + $0x264] sm:$0xf]  ;;  %v3227_v33 = vld [vmem:[%s6669_s1 + $0x270] sm:$0xf0]  ;;  %v3166_v37 = vor.u32 %v4365_v29, %v3163_v31 }
  0x37   : > { %664 = vmatpush.bf16.msrb.mxu1 %v3182_v13  ;;  %v4397_v34 = vld [vmem:[%s6669_s1 + $0x364] sm:$0xf]  ;;  %v3291_v35 = vld [vmem:[%s6669_s1 + $0x370] sm:$0xf0]  ;;  %v3230_v38 = vor.u32 %v4381_v32, %v3227_v33  ;;  %v3329_v32 = vld [vmem:[%s6669_s1 + $0x400] sm:$0xf] }
  0x38   : > { %678 = vmatpush.bf16.msrb.mxu2 %v3246_v14  ;;  %v4347_v39 = vld [vmem:[%s6669_s1 + $0x44] sm:$0xf]  ;;  %v3091_v40 = vld [vmem:[%s6669_s1 + $0x50] sm:$0xf0]  ;;  %v3294_v42 = vor.u32 %v4397_v34, %v3291_v35  ;;  %v4407_v33 = vld [vmem:[%s6669_s1 + $0x40c] sm:$0xf0] }
  0x39   : > { %692 = vmatpush.bf16.msrb.mxu3 %v3310_v18  ;;  %v4363_v41 = vld [vmem:[%s6669_s1 + $0x144] sm:$0xf]  ;;  %v3155_v43 = vld [vmem:[%s6669_s1 + $0x150] sm:$0xf0]  ;;  %v3094_v48 = vor.u32 %v4347_v39, %v3091_v40  ;;  %v3330_v35 = vor.u32 %v4407_v33, %v3329_v32  ;;  %v3333_v40 = vld [vmem:[%s6669_s1 + $0x420] sm:$0xf] }
  0x3a   : > { %651 = vmatpush.bf16.msrb.mxu0 %v3110_v24  ;;  %v4379_v44 = vld [vmem:[%s6669_s1 + $0x244] sm:$0xf]  ;;  %v3219_v45 = vld [vmem:[%s6669_s1 + $0x250] sm:$0xf0]  ;;  %v3158_v49 = vor.u32 %v4363_v41, %v3155_v43  ;;  %v4408_v41 = vld [vmem:[%s6669_s1 + $0x42c] sm:$0xf0] }
  0x3b   : > { %665 = vmatpush.bf16.msrb.mxu1 %v3174_v25  ;;  %v4395_v46 = vld [vmem:[%s6669_s1 + $0x344] sm:$0xf]  ;;  %v3283_v47 = vld [vmem:[%s6669_s1 + $0x350] sm:$0xf0]  ;;  %v3222_v50 = vor.u32 %v4379_v44, %v3219_v45  ;;  %v3450_v32 = vld [vmem:[%s6669_s1 + $0x600] sm:$0xf] }
  0x3c   : > { %679 = vmatpush.bf16.msrb.mxu2 %v3238_v26  ;;  %v4345_v51 = vld [vmem:[%s6669_s1 + $0x24] sm:$0xf]  ;;  %v3083_v52 = vld [vmem:[%s6669_s1 + $0x30] sm:$0xf0]  ;;  %v3286_v54 = vor.u32 %v4395_v46, %v3283_v47  ;;  %v3334_v46 = vor.u32 %v4408_v41, %v3333_v40  ;;  %v4436_v33 = vld [vmem:[%s6669_s1 + $0x60c] sm:$0xf0] }
  0x3d   : > { %693 = vmatpush.bf16.msrb.mxu3 %v3302_v30  ;;  %v4361_v53 = vld [vmem:[%s6669_s1 + $0x124] sm:$0xf]  ;;  %v3147_v56 = vld [vmem:[%s6669_s1 + $0x130] sm:$0xf0]  ;;  %v3086_v63 = vor.u32 %v4345_v51, %v3083_v52  ;;  %v3451_v40 = vor.u32 %v4436_v33, %v3450_v32  ;;  %v3442_v41 = vld [vmem:[%s6669_s1 + $0x5e0] sm:$0xf] }
  0x3e   : > { %652 = vmatpush.bf16.msrb.mxu0 %v3102_v36  ;;  %v4377_v57 = vld [vmem:[%s6669_s1 + $0x224] sm:$0xf]  ;;  %v3211_v58 = vld [vmem:[%s6669_s1 + $0x230] sm:$0xf0]  ;;  %v3150_v0 = vor.u32 %v4361_v53, %v3147_v56  ;;  %v3610_v33 = vld [vmem:[%s6669_s1 + $0x880] sm:$0xf] }
  0x3f   : > { %666 = vmatpush.bf16.msrb.mxu1 %v3166_v37  ;;  %v4393_v61 = vld [vmem:[%s6669_s1 + $0x324] sm:$0xf]  ;;  %v3275_v62 = vld [vmem:[%s6669_s1 + $0x330] sm:$0xf0]  ;;  %v3214_v1 = vor.u32 %v4377_v57, %v3211_v58 }
  0x40   : > { %680 = vmatpush.bf16.msrb.mxu2 %v3230_v38  ;;  %v4343_v3 = vld [vmem:[%s6669_s1 + $0x4] sm:$0xf]  ;;  %v3075_v4 = vld [vmem:[%s6669_s1 + $0x10] sm:$0xf0]  ;;  %v3278_v6 = vor.u32 %v4393_v61, %v3275_v62  ;;  %v3337_v62 = vld [vmem:[%s6669_s1 + $0x440] sm:$0xf] }
  0x41   : > { %694 = vmatpush.bf16.msrb.mxu3 %v3294_v42  ;;  %v4359_v5 = vld [vmem:[%s6669_s1 + $0x104] sm:$0xf]  ;;  %v3139_v7 = vld [vmem:[%s6669_s1 + $0x110] sm:$0xf0]  ;;  %v3078_v12 = vor.u32 %v4343_v3, %v3075_v4  ;;  %v4410_v3 = vld [vmem:[%s6669_s1 + $0x46c] sm:$0xf0] }
  0x42   : > { %653 = vmatpush.bf16.msrb.mxu0 %v3094_v48  ;;  %v4375_v8 = vld [vmem:[%s6669_s1 + $0x204] sm:$0xf]  ;;  %v3203_v9 = vld [vmem:[%s6669_s1 + $0x210] sm:$0xf0]  ;;  %v3142_v13 = vor.u32 %v4359_v5, %v3139_v7  ;;  %v3410_v5 = vld [vmem:[%s6669_s1 + $0x560] sm:$0xf] }
  0x43   : > { %667 = vmatpush.bf16.msrb.mxu1 %v3158_v49  ;;  %v4391_v10 = vld [vmem:[%s6669_s1 + $0x304] sm:$0xf]  ;;  %v3267_v11 = vld [vmem:[%s6669_s1 + $0x310] sm:$0xf0]  ;;  %v3206_v14 = vor.u32 %v4375_v8, %v3203_v9  ;;  %v3402_v8 = vld [vmem:[%s6669_s1 + $0x540] sm:$0xf] }
  0x44   : > { %681 = vmatpush.bf16.msrb.mxu2 %v3222_v50  ;;  %v3270_v15 = vor.u32 %v4391_v10, %v3267_v11  ;;  %v246_v16 = vld [vmem:[%s6670_s2] ss:$8 sm:$0x3]  ;;  %v4424_v9 = vld [vmem:[%s6669_s1 + $0x54c] sm:$0xf0] }
  0x45   : > { %695 = vmatpush.bf16.msrb.mxu3 %v3286_v54  ;;  %v248_v17 = vperm.slane %v246_v16, 0  ;;  %v249_v36 = vperm.slane %v246_v16, 1  ;;  %v3403_v10 = vor.u32 %v4424_v9, %v3402_v8  ;;  %v3394_v11 = vld [vmem:[%s6669_s1 + $0x520] sm:$0xf]  ;;  %v4432_v8 = vld [vmem:[%s6669_s1 + $0x5cc] sm:$0xf0] }
  0x46   : > { %654 = vmatpush.bf16.msrb.mxu0 %v3086_v63  ;;  %v4409_v63 = vld [vmem:[%s6669_s1 + $0x44c] sm:$0xf0]  ;;  %v3386_v16 = vld [vmem:[%s6669_s1 + $0x500] sm:$0xf] }
  0x47   : > { %668 = vmatpush.bf16.msrb.mxu1 %v3150_v0  ;;  %v3338_v0 = vor.u32 %v4409_v63, %v3337_v62  ;;  %v4454_v62 = vld [vmem:[%s6669_s1 + $0x72c] sm:$0xf0]  ;;  %v3498_v9 = vld [vmem:[%s6669_s1 + $0x6c0] sm:$0xf] }
  0x48   : > { %682 = vmatpush.bf16.msrb.mxu2 %v3214_v1  ;;  %v3341_v1 = vld [vmem:[%s6669_s1 + $0x460] sm:$0xf] }
  0x49   : > { %696 = vmatpush.bf16.msrb.mxu3 %v3278_v6  ;;  %v5138_v4 = vor.u32 %v4410_v3, %v3341_v1  ;;  %v4426_v6 = vld [vmem:[%s6669_s1 + $0x56c] sm:$0xf0] }
  0x4a   : > { %655 = vmatpush.bf16.msrb.mxu0 %v3078_v12  ;;  %v3411_v7 = vor.u32 %v4426_v6, %v3410_v5  ;;  %v4422_v12 = vld [vmem:[%s6669_s1 + $0x52c] sm:$0xf0] }
  0x4b   : > { %669 = vmatpush.bf16.msrb.mxu1 %v3142_v13  ;;  %v3474_v13 = vld [vmem:[%s6669_s1 + $0x660] sm:$0xf]  ;;  %v4452_v1 = vld [vmem:[%s6669_s1 + $0x70c] sm:$0xf0] }
  0x4c   : > { %683 = vmatpush.bf16.msrb.mxu2 %v3206_v14  ;;  %v4442_v14 = vld [vmem:[%s6669_s1 + $0x66c] sm:$0xf0] }
  0x4d   : > { %697 = vmatpush.bf16.msrb.mxu3 %v3270_v15  ;;  %656 = vmatmul.bf16.vlgmr.msrb.gmra.mxu0 %v4949_v59  ;;  %v3395_v15 = vor.u32 %v4422_v12, %v3394_v11  ;;  %v4450_v5 = vld [vmem:[%s6669_s1 + $0x6ec] sm:$0xf0]  ;;  %v3634_v12 = vld [vmem:[%s6669_s1 + $0x8e0] sm:$0xf] }
  0x4e   : > { %670 = vmatmul.bf16.vlgmr.msrb.gmra.mxu1 %v4953_v2  ;;  %v4448_v11 = vld [vmem:[%s6669_s1 + $0x6cc] sm:$0xf0] }
  0x4f   : > { %684 = vmatmul.bf16.vlgmr.msrb.gmra.mxu2 %v4947_v55 }
  0x50   : > { %698 = vmatmul.bf16.vlgmr.msrb.gmra.mxu3 %v4951_v60  ;;  %1592 = vmatpush.bf16.msra.mxu2 %v3411_v7  ;;  %v3434_v7 = vld [vmem:[%s6669_s1 + $0x5c0] sm:$0xf] }
  0x54   : > { %1593 = vmatpush.bf16.msra.mxu2 %v3403_v10  ;;  %v3435_v10 = vor.u32 %v4432_v8, %v3434_v7  ;;  %v4500_v7 = vld [vmem:[%s6669_s1 + $0xa0c] sm:$0xf0] }
  0x58   : > { %1594 = vmatpush.bf16.msra.mxu2 %v3395_v15 }
  0xab   : > { %v615_v20 = vpop.f32.mrf.mxu1 }
  0xad   : > { %v601_v18 = vpop.f32.mrf.mxu0 }
  0xae   : > { %v602_v19 = vadd.f32 %v601_v18, %v248_v17  ;;  %v3466_v18 = vld [vmem:[%s6669_s1 + $0x640] sm:$0xf] }
  0xb0   : > { %v616_v21 = vadd.f32 %v615_v20, %v602_v19  ;;  %v4440_v19 = vld [vmem:[%s6669_s1 + $0x64c] sm:$0xf0] }
  0xb1   : > { %v4420_v20 = vld [vmem:[%s6669_s1 + $0x50c] sm:$0xf0] }
  0xb2   : > { %v629_v22 = vpop.f32.mrf.mxu2 }
  0xb3   : > { %v630_v24 = vadd.f32 %v629_v22, %v616_v21  ;;  %v617_v26 = vpop.f32.mrf.mxu1  ;;  %v3666_v21 = vld [vmem:[%s6669_s1 + $0x960] sm:$0xf]  ;;  %v4490_v22 = vld [vmem:[%s6669_s1 + $0x96c] sm:$0xf0] }
  0xb5   : > { %v643_v23 = vpop.f32.mrf.mxu3  ;;  %v603_v25 = vpop.f32.mrf.mxu0 }
  0xb6   : > { %v604_v59 = vadd.f32 %v603_v25, %v248_v17  ;;  %v644_v27 = vadd.f32 %v643_v23, %v630_v24  ;;  %v3475_v17 = vor.u32 %v4442_v14, %v3474_v13  ;;  %v3467_v23 = vor.u32 %v4440_v19, %v3466_v18  ;;  %v3458_v25 = vld [vmem:[%s6669_s1 + $0x620] sm:$0xf]  ;;  %v4482_v13 = vld [vmem:[%s6669_s1 + $0x8ec] sm:$0xf0] }
  0xb7   : > { %v3667_v24 = vor.u32 %v4490_v22, %v3666_v21  ;;  %v3499_v14 = vor.u32 %v4448_v11, %v3498_v9  ;;  %v3635_v15 = vor.u32 %v4482_v13, %v3634_v12  ;;  %v3490_v18 = vld [vmem:[%s6669_s1 + $0x6a0] sm:$0xf]  ;;  %v4480_v22 = vld [vmem:[%s6669_s1 + $0x8cc] sm:$0xf0]  ;;  %v4419_v9 = vld [vmem:[%s6669_s1 + $0x504] sm:$0xf] }
  0xb8   : > { %v618_v2 = vadd.f32 %v617_v26, %v604_v59  ;;  %v704_v29 = vmax.f32 %v644_v27, 0.0  ;;  %1606 = vmatpush.bf16.msra.mxu3 %v3475_v17  ;;  %v4438_v59 = vld [vmem:[%s6669_s1 + $0x62c] sm:$0xf0]  ;;  %v3658_v26 = vld [vmem:[%s6669_s1 + $0x940] sm:$0xf]  ;;  %v3387_v27 = vor.u32 %v4420_v20, %v3386_v16 }
  0xb9   : > { %v3426_v16 = vld [vmem:[%s6669_s1 + $0x5a0] sm:$0xf]  ;;  %v4430_v17 = vld [vmem:[%s6669_s1 + $0x5ac] sm:$0xf0] }
  0xba   : > { %v631_v55 = vpop.f32.mrf.mxu2  ;;  %1595 = vmatpush.bf16.msra.mxu2 %v3387_v27  ;;  %v3427_v19 = vor.u32 %v4430_v17, %v3426_v16  ;;  %v4446_v20 = vld [vmem:[%s6669_s1 + $0x6ac] sm:$0xf0]  ;;  %v3626_v21 = vld [vmem:[%s6669_s1 + $0x8c0] sm:$0xf] }
  0xbb   : > { %v632_v28 = vadd.f32 %v631_v55, %v618_v2  ;;  %v4488_v2 = vld [vmem:[%s6669_s1 + $0x94c] sm:$0xf0]  ;;  %v3378_v55 = vld [vmem:[%s6669_s1 + $0x4e0] sm:$0xf] }
  0xbc   : > { %1607 = vmatpush.bf16.msra.mxu3 %v3467_v23  ;;  %v3491_v23 = vor.u32 %v4446_v20, %v3490_v18  ;;  %v4444_v27 = vld [vmem:[%s6669_s1 + $0x68c] sm:$0xf0]  ;;  %v3562_v12 = vld [vmem:[%s6669_s1 + $0x7c0] sm:$0xf]  ;;  %v3380_v20 = vld [vmem:[%s6669_s1 + $0x4f0] sm:$0xf0] }
  0xbd   : > { %v645_v60 = vpop.f32.mrf.mxu3  ;;  %v4464_v13 = vld [vmem:[%s6669_s1 + $0x7cc] sm:$0xf0] }
  0xbe   : > { %v646_v30 = vadd.f32 %v645_v60, %v632_v28  ;;  %v3659_v28 = vor.u32 %v4488_v2, %v3658_v26  ;;  %v4418_v60 = vld [vmem:[%s6669_s1 + $0x4ec] sm:$0xf0]  ;;  %v3482_v26 = vld [vmem:[%s6669_s1 + $0x680] sm:$0xf] }
  0xbf   : > { %v4498_v16 = vld [vmem:[%s6669_s1 + $0x9ec] sm:$0xf0] }
  0xc0   : > { %v706_v31 = vmax.f32 %v646_v30, 0.0  ;;  %v4486_v30 = vld [vmem:[%s6669_s1 + $0x92c] sm:$0xf0] }
  0xc2   : > { %v708_v34 = vpack.c.bf16 %v706_v31, %v704_v29  ;;  %v3650_v29 = vld [vmem:[%s6669_s1 + $0x920] sm:$0xf]  ;;  %v3459_v31 = vor.u32 %v4438_v59, %v3458_v25  ;;  %v4428_v59 = vld [vmem:[%s6669_s1 + $0x58c] sm:$0xf0] }
  0xc3   : > { %v3418_v25 = vld [vmem:[%s6669_s1 + $0x580] sm:$0xf] }
  0xc4   : > { %758 = vmatpush.bf16.msra.mxu0 %v708_v34  ;;  %v3379_v34 = vor.u32 %v4418_v60, %v3378_v55  ;;  %1608 = vmatpush.bf16.msra.mxu3 %v3459_v31  ;;  %v3419_v2 = vor.u32 %v4428_v59, %v3418_v25  ;;  %v3618_v55 = vld [vmem:[%s6669_s1 + $0x8a0] sm:$0xf]  ;;  %v3483_v60 = vor.u32 %v4444_v27, %v3482_v26  ;;  %v4474_v31 = vld [vmem:[%s6669_s1 + $0x86c] sm:$0xf0]  ;;  %v3372_v27 = vld [vmem:[%s6669_s1 + $0x4d0] sm:$0xf0] }
  0xc5   : > { %v4496_v25 = vld [vmem:[%s6669_s1 + $0x9cc] sm:$0xf0] }
  0xc6   : > { %1596 = vmatpush.bf16.msra.mxu2 %v3379_v34  ;;  %v4476_v34 = vld [vmem:[%s6669_s1 + $0x88c] sm:$0xf0] }
  0xc7   : > { %3343 = vmatmul.msk.bf16.vlgmr.msra.gmra.mxu0 %vm738_vm0, %v3330_v35 }
  0xc8   : > { %1648 = vmatpush.bf16.msrb.mxu0 %v3667_v24  ;;  %1609 = vmatpush.bf16.msra.mxu3 %v3451_v40  ;;  %v3627_v24 = vor.u32 %v4480_v22, %v3626_v21  ;;  %v4506_v40 = vld [vmem:[%s6669_s1 + $0xa6c] sm:$0xf0]  ;;  %v3554_v21 = vld [vmem:[%s6669_s1 + $0x7a0] sm:$0xf] }
  0xca   : > { %v657_v37 = vpop.f32.mrf.mxu0 }
  0xcb   : > { %v671_v38 = vpop.f32.mrf.mxu1  ;;  %v658_v39 = vadd.f32 %v657_v37, %v249_v36  ;;  %v4416_v37 = vld [vmem:[%s6669_s1 + $0x4cc] sm:$0xf0] }
  0xcc   : > { %1649 = vmatpush.bf16.msrb.mxu0 %v3659_v28  ;;  %v4478_v28 = vld [vmem:[%s6669_s1 + $0x8ac] sm:$0xf0] }
  0xcd   : > { %v672_v43 = vadd.f32 %v671_v38, %v658_v39  ;;  %v3642_v38 = vld [vmem:[%s6669_s1 + $0x900] sm:$0xf]  ;;  %v4484_v39 = vld [vmem:[%s6669_s1 + $0x90c] sm:$0xf0] }
  0xd2   : > { %v685_v42 = vpop.f32.mrf.mxu2  ;;  %v659_v45 = vpop.f32.mrf.mxu0 }
  0xd3   : > { %v699_v44 = vpop.f32.mrf.mxu3  ;;  %v660_v47 = vadd.f32 %v659_v45, %v249_v36  ;;  %v686_v48 = vadd.f32 %v685_v42, %v672_v43  ;;  %v673_v49 = vpop.f32.mrf.mxu1  ;;  %v3651_v36 = vor.u32 %v4486_v30, %v3650_v29  ;;  %v4434_v42 = vld [vmem:[%s6669_s1 + $0x5ec] sm:$0xf0]  ;;  %v3362_v45 = vld [vmem:[%s6669_s1 + $0x4a0] sm:$0xf]  ;;  %v3619_v29 = vor.u32 %v4478_v28, %v3618_v55 }
  0xd4   : > { %v3602_v30 = vld [vmem:[%s6669_s1 + $0x860] sm:$0xf] }
  0xd5   : > { %v674_v50 = vadd.f32 %v673_v49, %v660_v47  ;;  %v700_v52 = vadd.f32 %v699_v44, %v686_v48  ;;  %1650 = vmatpush.bf16.msrb.mxu0 %v3651_v36  ;;  %v3643_v44 = vor.u32 %v4484_v39, %v3642_v38  ;;  %v3443_v47 = vor.u32 %v4434_v42, %v3442_v41  ;;  %v3354_v49 = vld [vmem:[%s6669_s1 + $0x480] sm:$0xf]  ;;  %v4425_v42 = vld [vmem:[%s6669_s1 + $0x564] sm:$0xf] }
  0xd6   : > { %v3603_v32 = vor.u32 %v4474_v31, %v3602_v30  ;;  %v3594_v36 = vld [vmem:[%s6669_s1 + $0x840] sm:$0xf]  ;;  %v4460_v30 = vld [vmem:[%s6669_s1 + $0x78c] sm:$0xf0] }
  0xd7   : > { %3344 = vmatmul.msk.bf16.gmra.mxu0 %vm738_vm0, %v3334_v46  ;;  %v705_v57 = vmax.f32 %v700_v52, 0.0  ;;  %v4458_v52 = vld [vmem:[%s6669_s1 + $0x76c] sm:$0xf0]  ;;  %1610 = vmatpush.bf16.msra.mxu3 %v3443_v47  ;;  %v3730_v38 = vld [vmem:[%s6669_s1 + $0xa60] sm:$0xf] }
  0xd8   : > { %v3731_v41 = vor.u32 %v4506_v40, %v3730_v38  ;;  %v3722_v47 = vld [vmem:[%s6669_s1 + $0xa40] sm:$0xf]  ;;  %v3364_v38 = vld [vmem:[%s6669_s1 + $0x4b0] sm:$0xf0] }
  0xd9   : > { %1651 = vmatpush.bf16.msrb.mxu0 %v3643_v44  ;;  %v3794_v28 = vld [vmem:[%s6669_s1 + $0xb60] sm:$0xf] }
  0xda   : > { %v687_v51 = vpop.f32.mrf.mxu2  ;;  %v3682_v31 = vld [vmem:[%s6669_s1 + $0x9a0] sm:$0xf] }
  0xdb   : > { %v688_v53 = vadd.f32 %v687_v51, %v674_v50  ;;  %v701_v54 = vpop.f32.mrf.mxu3  ;;  %v4412_v50 = vld [vmem:[%s6669_s1 + $0x48c] sm:$0xf0]  ;;  %v3538_v51 = vld [vmem:[%s6669_s1 + $0x760] sm:$0xf]  ;;  %1611 = vmatpush.bf16.msra.mxu3 %v3435_v10  ;;  %v3388_v10 = vld [vmem:[%s6669_s1 + $0x510] sm:$0xf0] }
  0xdc   : > { %v3391_v11 = vor.u32 %v4419_v9, %v3388_v10  ;;  %v3786_v40 = vld [vmem:[%s6669_s1 + $0xb40] sm:$0xf] }
  0xdd   : > { %v702_v56 = vadd.f32 %v701_v54, %v688_v53  ;;  %v3355_v53 = vor.u32 %v4412_v50, %v3354_v49  ;;  %v3539_v54 = vor.u32 %v4458_v52, %v3538_v51  ;;  %1652 = vmatpush.bf16.msrb.mxu0 %v3635_v15  ;;  %v4423_v51 = vld [vmem:[%s6669_s1 + $0x544] sm:$0xf]  ;;  %v3404_v52 = vld [vmem:[%s6669_s1 + $0x550] sm:$0xf0]  ;;  %v3563_v15 = vor.u32 %v4464_v13, %v3562_v12  ;;  %v3754_v13 = vld [vmem:[%s6669_s1 + $0xac0] sm:$0xf] }
  0xdf   : > { %v707_v58 = vmax.f32 %v702_v56, 0.0  ;;  %v3530_v56 = vld [vmem:[%s6669_s1 + $0x740] sm:$0xf]  ;;  %1612 = vmatpush.bf16.msra.mxu3 %v3427_v19  ;;  %v4417_v19 = vld [vmem:[%s6669_s1 + $0x4e4] sm:$0xf] }
  0xe0   : > { %v3383_v22 = vor.u32 %v4417_v19, %v3380_v20  ;;  %v3746_v19 = vld [vmem:[%s6669_s1 + $0xaa0] sm:$0xf]  ;;  %v4510_v20 = vld [vmem:[%s6669_s1 + $0xaac] sm:$0xf0] }
  0xe1   : > { %v709_v61 = vpack.c.bf16 %v707_v58, %v705_v57  ;;  %v4456_v57 = vld [vmem:[%s6669_s1 + $0x74c] sm:$0xf0]  ;;  %1653 = vmatpush.bf16.msrb.mxu0 %v3627_v24  ;;  %v3690_v24 = vld [vmem:[%s6669_s1 + $0x9c0] sm:$0xf] }
  0xe2   : > { %v3531_v58 = vor.u32 %v4456_v57, %v3530_v56  ;;  %v4468_v56 = vld [vmem:[%s6669_s1 + $0x80c] sm:$0xf0]  ;;  %v3714_v57 = vld [vmem:[%s6669_s1 + $0xa20] sm:$0xf]  ;;  %v3691_v26 = vor.u32 %v4496_v25, %v3690_v24  ;;  %v3436_v24 = vld [vmem:[%s6669_s1 + $0x5d0] sm:$0xf0] }
  0xe3   : > { %787 = vmatpush.bf16.msra.mxu1 %v709_v61  ;;  %v3522_v61 = vld [vmem:[%s6669_s1 + $0x720] sm:$0xf]  ;;  %1613 = vmatpush.bf16.msra.mxu3 %v3419_v2  ;;  %v4415_v2 = vld [vmem:[%s6669_s1 + $0x4c4] sm:$0xf] }
  0xe4   : > { %v3523_v63 = vor.u32 %v4454_v62, %v3522_v61  ;;  %v3375_v55 = vor.u32 %v4415_v2, %v3372_v27  ;;  %v3738_v2 = vld [vmem:[%s6669_s1 + $0xa80] sm:$0xf]  ;;  %v4508_v27 = vld [vmem:[%s6669_s1 + $0xa8c] sm:$0xf0] }
  0xe5   : > { %1654 = vmatpush.bf16.msrb.mxu0 %v3619_v29  ;;  %v3546_v29 = vld [vmem:[%s6669_s1 + $0x780] sm:$0xf] }
  0xe6   : > { %3347 = vmatmul.msk.bf16.vlgmr.msra.gmra.mxu1 %vm738_vm0, %v3330_v35  ;;  %v3370_v35 = vld [vmem:[%s6669_s1 + $0x4c0] sm:$0xf] }
  0xe7   : > { %3345 = vmatmul.msk.bf16.gmra.mxu0 %vm738_vm0, %v3338_v0  ;;  %v3371_v43 = vor.u32 %v4416_v37, %v3370_v35  ;;  %v3611_v35 = vor.u32 %v4476_v34, %v3610_v33  ;;  %v4472_v37 = vld [vmem:[%s6669_s1 + $0x84c] sm:$0xf0]  ;;  %1634 = vmatpush.bf16.msrb.mxu3 %v3603_v32  ;;  %v3547_v32 = vor.u32 %v4460_v30, %v3546_v29  ;;  %v4429_v30 = vld [vmem:[%s6669_s1 + $0x5a4] sm:$0xf] }
  0xe8   : > { %v3595_v39 = vor.u32 %v4472_v37, %v3594_v36  ;;  %1662 = vmatpush.bf16.msrb.mxu1 %v3731_v41  ;;  %v4494_v33 = vld [vmem:[%s6669_s1 + $0x9ac] sm:$0xf0]  ;;  %v4413_v37 = vld [vmem:[%s6669_s1 + $0x4a4] sm:$0xf] }
  0xe9   : > { %1597 = vmatpush.bf16.msra.mxu2 %v3371_v43  ;;  %v3412_v43 = vld [vmem:[%s6669_s1 + $0x570] sm:$0xf0]  ;;  %1655 = vmatpush.bf16.msrb.mxu0 %v3611_v35  ;;  %v3683_v36 = vor.u32 %v4494_v33, %v3682_v31  ;;  %v4520_v41 = vld [vmem:[%s6669_s1 + $0xb4c] sm:$0xf0] }
  0xea   : > { %v3415_v44 = vor.u32 %v4425_v42, %v3412_v43  ;;  %v3367_v42 = vor.u32 %v4413_v37, %v3364_v38  ;;  %v3674_v43 = vld [vmem:[%s6669_s1 + $0x980] sm:$0xf]  ;;  %v4538_v29 = vld [vmem:[%s6669_s1 + $0xc6c] sm:$0xf0]  ;;  %v3428_v31 = vld [vmem:[%s6669_s1 + $0x5b0] sm:$0xf0] }
  0xeb   : > { %1635 = vmatpush.bf16.msrb.mxu3 %v3595_v39  ;;  %v3431_v33 = vor.u32 %v4429_v30, %v3428_v31  ;;  %v4479_v31 = vld [vmem:[%s6669_s1 + $0x8c4] sm:$0xf] }
  0xed   : > { %1704 = vmatpush.bf16.msra.mxu0 %v3415_v44  ;;  %v4492_v44 = vld [vmem:[%s6669_s1 + $0x98c] sm:$0xf0] }
  0xf6   : > { %3348 = vmatmul.msk.bf16.gmra.mxu1 %vm738_vm0, %v3334_v46  ;;  %v4414_v46 = vld [vmem:[%s6669_s1 + $0x4ac] sm:$0xf0] }
  0xf7   : > { %3346 = vmatmul.msk.bf16.gmra.mxu0 %vm738_vm0, %v5138_v4  ;;  %v3363_v48 = vor.u32 %v4414_v46, %v3362_v45  ;;  %v3586_v45 = vld [vmem:[%s6669_s1 + $0x820] sm:$0xf]  ;;  %v4470_v46 = vld [vmem:[%s6669_s1 + $0x82c] sm:$0xf0] }
  0xf8   : > { %v3587_v49 = vor.u32 %v4470_v46, %v3586_v45  ;;  %v4411_v45 = vld [vmem:[%s6669_s1 + $0x484] sm:$0xf]  ;;  %v3675_v46 = vor.u32 %v4492_v44, %v3674_v43  ;;  %v4536_v44 = vld [vmem:[%s6669_s1 + $0xc4c] sm:$0xf0] }
  0xf9   : > { %1598 = vmatpush.bf16.msra.mxu2 %v3363_v48  ;;  %v4504_v48 = vld [vmem:[%s6669_s1 + $0xa4c] sm:$0xf0] }
  0xfa   : > { %v3723_v50 = vor.u32 %v4504_v48, %v3722_v47  ;;  %1636 = vmatpush.bf16.msrb.mxu3 %v3587_v49  ;;  %v3356_v47 = vld [vmem:[%s6669_s1 + $0x490] sm:$0xf0]  ;;  %v3787_v48 = vor.u32 %v4520_v41, %v3786_v40  ;;  %v3850_v40 = vld [vmem:[%s6669_s1 + $0xc40] sm:$0xf]  ;;  %v4455_v41 = vld [vmem:[%s6669_s1 + $0x744] sm:$0xf] }
  0xfb   : > { %v3359_v49 = vor.u32 %v4411_v45, %v3356_v47  ;;  %v4427_v45 = vld [vmem:[%s6669_s1 + $0x584] sm:$0xf] }
  0xfc   : > { %1663 = vmatpush.bf16.msrb.mxu1 %v3723_v50  ;;  %v4441_v50 = vld [vmem:[%s6669_s1 + $0x664] sm:$0xf] }
  0xfd   : > { %1599 = vmatpush.bf16.msra.mxu2 %v3355_v53  ;;  %v3407_v53 = vor.u32 %v4423_v51, %v3404_v52  ;;  %v3476_v51 = vld [vmem:[%s6669_s1 + $0x670] sm:$0xf0]  ;;  %v3778_v52 = vld [vmem:[%s6669_s1 + $0xb20] sm:$0xf] }
  0xff   : > { %1705 = vmatpush.bf16.msra.mxu0 %v3407_v53  ;;  %v4518_v53 = vld [vmem:[%s6669_s1 + $0xb2c] sm:$0xf0] }
 0x101   : > { %1620 = vmatpush.bf16.msrb.mxu2 %v3539_v54  ;;  %v3578_v54 = vld [vmem:[%s6669_s1 + $0x800] sm:$0xf] }
 0x102   : > { %v3579_v61 = vor.u32 %v4468_v56, %v3578_v54  ;;  %v3479_v54 = vor.u32 %v4441_v50, %v3476_v51  ;;  %v4439_v56 = vld [vmem:[%s6669_s1 + $0x644] sm:$0xf] }
 0x104   : > { %1637 = vmatpush.bf16.msrb.mxu3 %v3579_v61  ;;  %v3468_v61 = vld [vmem:[%s6669_s1 + $0x650] sm:$0xf0] }
 0x105   : > { %1621 = vmatpush.bf16.msrb.mxu2 %v3531_v58  ;;  %v4502_v58 = vld [vmem:[%s6669_s1 + $0xa2c] sm:$0xf0] }
 0x106   : > { %3349 = vmatmul.msk.bf16.gmra.mxu1 %vm738_vm0, %v3338_v0  ;;  %v3514_v0 = vld [vmem:[%s6669_s1 + $0x700] sm:$0xf]  ;;  %v3715_v62 = vor.u32 %v4502_v58, %v3714_v57  ;;  %v3779_v58 = vor.u32 %v4518_v53, %v3778_v52  ;;  %v4487_v52 = vld [vmem:[%s6669_s1 + $0x944] sm:$0xf]  ;;  %v3660_v53 = vld [vmem:[%s6669_s1 + $0x950] sm:$0xf0] }
 0x107   : > { %v3515_v3 = vor.u32 %v4452_v1, %v3514_v0  ;;  %v3396_v0 = vld [vmem:[%s6669_s1 + $0x530] sm:$0xf0] }
 0x108   : > { %1664 = vmatpush.bf16.msrb.mxu1 %v3715_v62  ;;  %v3770_v62 = vld [vmem:[%s6669_s1 + $0xb00] sm:$0xf] }
 0x109   : > { %1622 = vmatpush.bf16.msrb.mxu2 %v3523_v63  ;;  %v4421_v63 = vld [vmem:[%s6669_s1 + $0x524] sm:$0xf] }
 0x10a   : > { %v3399_v1 = vor.u32 %v4421_v63, %v3396_v0  ;;  %v4516_v63 = vld [vmem:[%s6669_s1 + $0xb0c] sm:$0xf0]  ;;  %v3471_v0 = vor.u32 %v4439_v56, %v3468_v61  ;;  %v4453_v56 = vld [vmem:[%s6669_s1 + $0x724] sm:$0xf] }
 0x10b   : > { %v4534_v61 = vld [vmem:[%s6669_s1 + $0xc2c] sm:$0xf0] }
 0x10c   : > { %1706 = vmatpush.bf16.msra.mxu0 %v3399_v1  ;;  %v4437_v1 = vld [vmem:[%s6669_s1 + $0x624] sm:$0xf] }
 0x10d   : > { %1623 = vmatpush.bf16.msrb.mxu2 %v3515_v3  ;;  %v3570_v3 = vld [vmem:[%s6669_s1 + $0x7e0] sm:$0xf] }
 0x110   : > { %1707 = vmatpush.bf16.msra.mxu0 %v3391_v11  ;;  %v3452_v11 = vld [vmem:[%s6669_s1 + $0x610] sm:$0xf0] }
 0x114   : > { %1708 = vmatpush.bf16.msra.mxu0 %v3383_v22 }
 0x116   : > { %3350 = vmatmul.msk.bf16.gmra.mxu1 %vm738_vm0, %v5138_v4  ;;  %v3506_v4 = vld [vmem:[%s6669_s1 + $0x6e0] sm:$0xf] }
 0x117   : > { %v3507_v6 = vor.u32 %v4450_v5, %v3506_v4  ;;  %v4466_v4 = vld [vmem:[%s6669_s1 + $0x7ec] sm:$0xf0]  ;;  %v3706_v5 = vld [vmem:[%s6669_s1 + $0xa00] sm:$0xf] }
 0x118   : > { %v3707_v8 = vor.u32 %v4500_v7, %v3706_v5  ;;  %1709 = vmatpush.bf16.msra.mxu0 %v3375_v55  ;;  %v4514_v7 = vld [vmem:[%s6669_s1 + $0xaec] sm:$0xf0]  ;;  %v3858_v55 = vld [vmem:[%s6669_s1 + $0xc60] sm:$0xf] }
 0x119   : > { %1624 = vmatpush.bf16.msrb.mxu2 %v3507_v6  ;;  %v3571_v6 = vor.u32 %v4466_v4, %v3570_v3  ;;  %v3460_v3 = vld [vmem:[%s6669_s1 + $0x630] sm:$0xf0]  ;;  %v3771_v4 = vor.u32 %v4516_v63, %v3770_v62  ;;  %v3859_v38 = vor.u32 %v4538_v29, %v3858_v55  ;;  %v3663_v62 = vor.u32 %v4487_v52, %v3660_v53  ;;  %v4528_v55 = vld [vmem:[%s6669_s1 + $0xbcc] sm:$0xf0]  ;;  %v4473_v53 = vld [vmem:[%s6669_s1 + $0x864] sm:$0xf] }
 0x11a   : > { %1665 = vmatpush.bf16.msrb.mxu1 %v3707_v8  ;;  %v3463_v5 = vor.u32 %v4437_v1, %v3460_v3  ;;  %v4435_v8 = vld [vmem:[%s6669_s1 + $0x604] sm:$0xf]  ;;  %v3652_v1 = vld [vmem:[%s6669_s1 + $0x930] sm:$0xf0] }
 0x11b   : > { %1638 = vmatpush.bf16.msrb.mxu3 %v3571_v6  ;;  %v3762_v6 = vld [vmem:[%s6669_s1 + $0xae0] sm:$0xf] }
 0x11c   : > { %1710 = vmatpush.bf16.msra.mxu0 %v3367_v42  ;;  %v3763_v10 = vor.u32 %v4514_v7, %v3762_v6  ;;  %v3532_v42 = vld [vmem:[%s6669_s1 + $0x750] sm:$0xf0]  ;;  %v3834_v7 = vld [vmem:[%s6669_s1 + $0xc00] sm:$0xf] }
 0x11d   : > { %1625 = vmatpush.bf16.msrb.mxu2 %v3499_v14  ;;  %v3698_v14 = vld [vmem:[%s6669_s1 + $0x9e0] sm:$0xf]  ;;  %v3535_v51 = vor.u32 %v4455_v41, %v3532_v42  ;;  %v3516_v6 = vld [vmem:[%s6669_s1 + $0x710] sm:$0xf0]  ;;  %v4477_v41 = vld [vmem:[%s6669_s1 + $0x8a4] sm:$0xf] }
 0x11e   : > { %v3699_v18 = vor.u32 %v4498_v16, %v3698_v14  ;;  %v4512_v14 = vld [vmem:[%s6669_s1 + $0xacc] sm:$0xf0]  ;;  %v4433_v16 = vld [vmem:[%s6669_s1 + $0x5e4] sm:$0xf] }
 0x11f   : > { %1639 = vmatpush.bf16.msrb.mxu3 %v3563_v15  ;;  %v3455_v15 = vor.u32 %v4435_v8, %v3452_v11  ;;  %v4532_v8 = vld [vmem:[%s6669_s1 + $0xc0c] sm:$0xf0] }
 0x120   : > { %1666 = vmatpush.bf16.msrb.mxu1 %v3699_v18  ;;  %1711 = vmatpush.bf16.msra.mxu0 %v3359_v49  ;;  %v3444_v18 = vld [vmem:[%s6669_s1 + $0x5f0] sm:$0xf0] }
 0x121   : > { %1626 = vmatpush.bf16.msrb.mxu2 %v3491_v23  ;;  %v4462_v23 = vld [vmem:[%s6669_s1 + $0x7ac] sm:$0xf0] }
 0x122   : > { %v3555_v59 = vor.u32 %v4462_v23, %v3554_v21  ;;  %v3447_v21 = vor.u32 %v4433_v16, %v3444_v18  ;;  %v4431_v23 = vld [vmem:[%s6669_s1 + $0x5c4] sm:$0xf]  ;;  %v3826_v18 = vld [vmem:[%s6669_s1 + $0xbe0] sm:$0xf] }
 0x123   : > { %v4449_v16 = vld [vmem:[%s6669_s1 + $0x6e4] sm:$0xf] }
 0x124   : > { %1640 = vmatpush.bf16.msrb.mxu3 %v3555_v59  ;;  %1667 = vmatpush.bf16.msrb.mxu1 %v3691_v26  ;;  %v3747_v59 = vor.u32 %v4510_v20, %v3746_v19  ;;  %v3439_v26 = vor.u32 %v4431_v23, %v3436_v24  ;;  %v4530_v19 = vld [vmem:[%s6669_s1 + $0xbec] sm:$0xf0]  ;;  %v3636_v23 = vld [vmem:[%s6669_s1 + $0x8f0] sm:$0xf0] }
 0x125   : > { %1627 = vmatpush.bf16.msrb.mxu2 %v3483_v60  ;;  %v4522_v60 = vld [vmem:[%s6669_s1 + $0xb6c] sm:$0xf0] }
 0x126   : > { %v3795_v35 = vor.u32 %v4522_v60, %v3794_v28  ;;  %v4457_v28 = vld [vmem:[%s6669_s1 + $0x764] sm:$0xf]  ;;  %v3540_v60 = vld [vmem:[%s6669_s1 + $0x770] sm:$0xf0] }
 0x128   : > { %1641 = vmatpush.bf16.msrb.mxu3 %v3547_v32  ;;  %1668 = vmatpush.bf16.msrb.mxu1 %v3683_v36  ;;  %v3739_v32 = vor.u32 %v4508_v27, %v3738_v2  ;;  %v3668_v36 = vld [vmem:[%s6669_s1 + $0x970] sm:$0xf0]  ;;  %v3818_v27 = vld [vmem:[%s6669_s1 + $0xbc0] sm:$0xf] }
 0x12c   : > { %1669 = vmatpush.bf16.msrb.mxu1 %v3675_v46  ;;  %v3420_v46 = vld [vmem:[%s6669_s1 + $0x590] sm:$0xf0] }
 0x12d   : > { %v3423_v49 = vor.u32 %v4427_v45, %v3420_v46  ;;  %v3802_v45 = vld [vmem:[%s6669_s1 + $0xb80] sm:$0xf]  ;;  %v4443_v46 = vld [vmem:[%s6669_s1 + $0x684] sm:$0xf] }
 0x130   : > { %1718 = vmatpush.bf16.msra.mxu1 %v3479_v54  ;;  %v3851_v54 = vor.u32 %v4536_v44, %v3850_v40 }
 0x134   : > { %1719 = vmatpush.bf16.msra.mxu1 %v3471_v0  ;;  %v4485_v0 = vld [vmem:[%s6669_s1 + $0x924] sm:$0xf] }
 0x138   : > { %1720 = vmatpush.bf16.msra.mxu1 %v3463_v5  ;;  %v4451_v5 = vld [vmem:[%s6669_s1 + $0x704] sm:$0xf] }
 0x139   : > { %v3519_v11 = vor.u32 %v4451_v5, %v3516_v6  ;;  %v4471_v6 = vld [vmem:[%s6669_s1 + $0x844] sm:$0xf] }
 0x13c   : > { %1721 = vmatpush.bf16.msra.mxu1 %v3455_v15  ;;  %v3835_v15 = vor.u32 %v4532_v8, %v3834_v7  ;;  %v3596_v7 = vld [vmem:[%s6669_s1 + $0x850] sm:$0xf0] }
 0x140   : > { %1722 = vmatpush.bf16.msra.mxu1 %v3447_v21 }
 0x144   : > { %v760_v17 = vpop.f32.mrf.mxu0  ;;  %1723 = vmatpush.bf16.msra.mxu1 %v3439_v26  ;;  %v3500_v26 = vld [vmem:[%s6669_s1 + $0x6d0] sm:$0xf0] }
 0x148   : > { %1724 = vmatpush.bf16.msra.mxu1 %v3431_v33  ;;  %v3819_v33 = vor.u32 %v4528_v55, %v3818_v27 }
 0x14c   : > { %v762_v34 = vpop.f32.mrf.mxu0  ;;  %1725 = vmatpush.bf16.msra.mxu1 %v3423_v49  ;;  %v4521_v49 = vld [vmem:[%s6669_s1 + $0xb64] sm:$0xf] }
 0x14d   : > { %v5476_v39 = vpack.c.bf16 %v762_v34, %v760_v17  ;;  %v3755_v17 = vor.u32 %v4512_v14, %v3754_v13  ;;  %v3543_v34 = vor.u32 %v4457_v28, %v3540_v60  ;;  %v4483_v13 = vld [vmem:[%s6669_s1 + $0x904] sm:$0xf]  ;;  %v3644_v14 = vld [vmem:[%s6669_s1 + $0x910] sm:$0xf0] }
 0x14e   : > { %v3647_v20 = vor.u32 %v4483_v13, %v3644_v14  ;;  %v3599_v14 = vor.u32 %v4471_v6, %v3596_v7  ;;  %v3860_v6 = vld [vmem:[%s6669_s1 + $0xc70] sm:$0xf0] }
 0x14f   : > { %1600 = vmatmul.bf16.vlgmr.msra.gmra.mxu2 %v5476_v39 }
 0x150   : > { %1676 = vmatpush.bf16.msra.mxu2 %v3795_v35  ;;  %v4489_v35 = vld [vmem:[%s6669_s1 + $0x964] sm:$0xf] }
 0x154   : > { %1677 = vmatpush.bf16.msra.mxu2 %v3787_v48  ;;  %v765_v57 = vpop.f32.mrf.mxu0  ;;  %v3671_v48 = vor.u32 %v4489_v35, %v3668_v36  ;;  %v3492_v35 = vld [vmem:[%s6669_s1 + $0x6b0] sm:$0xf0]  ;;  %v3810_v36 = vld [vmem:[%s6669_s1 + $0xba0] sm:$0xf] }
 0x158   : > { %1678 = vmatpush.bf16.msra.mxu2 %v3779_v58  ;;  %v3842_v58 = vld [vmem:[%s6669_s1 + $0xc20] sm:$0xf] }
 0x15c   : > { %1679 = vmatpush.bf16.msra.mxu2 %v3771_v4  ;;  %v767_v9 = vpop.f32.mrf.mxu0  ;;  %v3843_v4 = vor.u32 %v4534_v61, %v3842_v58  ;;  %v3612_v58 = vld [vmem:[%s6669_s1 + $0x890] sm:$0xf0] }
 0x15d   : > { %v5539_v12 = vpack.c.bf16 %v767_v9, %v765_v57  ;;  %v3524_v57 = vld [vmem:[%s6669_s1 + $0x730] sm:$0xf0] }
 0x15e   : > { %v3527_v63 = vor.u32 %v4453_v56, %v3524_v57  ;;  %v4475_v57 = vld [vmem:[%s6669_s1 + $0x884] sm:$0xf] }
 0x15f   : > { %1628 = vmatmul.bf16.vlgmr.msrb.gmra.mxu2 %v5539_v12  ;;  %v3615_v5 = vor.u32 %v4475_v57, %v3612_v58  ;;  %v3556_v57 = vld [vmem:[%s6669_s1 + $0x7b0] sm:$0xf0] }
 0x160   : > { %1680 = vmatpush.bf16.msra.mxu2 %v3763_v10  ;;  %v3655_v10 = vor.u32 %v4485_v0, %v3652_v1  ;;  %v3732_v1 = vld [vmem:[%s6669_s1 + $0xa70] sm:$0xf0] }
 0x163   : > { %v789_v22 = vpop.f32.mrf.mxu1 }
 0x164   : > { %1681 = vmatpush.bf16.msra.mxu2 %v3755_v17  ;;  %v770_v25 = vpop.f32.mrf.mxu0  ;;  %v3508_v17 = vld [vmem:[%s6669_s1 + $0x6f0] sm:$0xf0] }
 0x165   : > { %v3511_v21 = vor.u32 %v4449_v16, %v3508_v17  ;;  %v4517_v16 = vld [vmem:[%s6669_s1 + $0xb24] sm:$0xf]  ;;  %v3780_v17 = vld [vmem:[%s6669_s1 + $0xb30] sm:$0xf0] }
 0x168   : > { %1682 = vmatpush.bf16.msra.mxu2 %v3747_v59  ;;  %v4447_v59 = vld [vmem:[%s6669_s1 + $0x6c4] sm:$0xf] }
 0x169   : > { %v3503_v30 = vor.u32 %v4447_v59, %v3500_v26  ;;  %v3772_v59 = vld [vmem:[%s6669_s1 + $0xb10] sm:$0xf0]  ;;  %v4467_v26 = vld [vmem:[%s6669_s1 + $0x804] sm:$0xf] }
 0x16b   : > { %v791_v37 = vpop.f32.mrf.mxu1 }
 0x16c   : > { %v5605_v43 = vpack.c.bf16 %v791_v37, %v789_v22  ;;  %1683 = vmatpush.bf16.msra.mxu2 %v3739_v32  ;;  %v772_v47 = vpop.f32.mrf.mxu0  ;;  %v4481_v22 = vld [vmem:[%s6669_s1 + $0x8e4] sm:$0xf]  ;;  %v3628_v32 = vld [vmem:[%s6669_s1 + $0x8d0] sm:$0xf0]  ;;  %v4526_v37 = vld [vmem:[%s6669_s1 + $0xbac] sm:$0xf0] }
 0x16d   : > { %v5616_v50 = vpack.c.bf16 %v772_v47, %v770_v25  ;;  %v3827_v25 = vor.u32 %v4530_v19, %v3826_v18  ;;  %v3639_v60 = vor.u32 %v4481_v22, %v3636_v23  ;;  %v3811_v44 = vor.u32 %v4526_v37, %v3810_v36  ;;  %v3484_v47 = vld [vmem:[%s6669_s1 + $0x690] sm:$0xf0]  ;;  %v4469_v18 = vld [vmem:[%s6669_s1 + $0x824] sm:$0xf] }
 0x16e   : > { %1614 = vmatmul.bf16.vlgmr.msra.gmra.mxu3 %v5605_v43  ;;  %v3487_v56 = vor.u32 %v4443_v46, %v3484_v47  ;;  %v3588_v19 = vld [vmem:[%s6669_s1 + $0x830] sm:$0xf0]  ;;  %v4501_v22 = vld [vmem:[%s6669_s1 + $0xa24] sm:$0xf] }
 0x16f   : > { %1690 = vmatpush.bf16.msra.mxu3 %v3859_v38  ;;  %1656 = vmatmul.bf16.vlgmr.msrb.gmra.mxu0 %v5616_v50  ;;  %v3631_v38 = vor.u32 %v4479_v31, %v3628_v32  ;;  %v3591_v23 = vor.u32 %v4469_v18, %v3588_v19  ;;  %v4513_v31 = vld [vmem:[%s6669_s1 + $0xae4] sm:$0xf]  ;;  %v3764_v32 = vld [vmem:[%s6669_s1 + $0xaf0] sm:$0xf0] }
 0x170   : > { %1732 = vmatpush.bf16.msrb.mxu2 %v3543_v34  ;;  %1760 = vmatpush.bf16.msrb.mxu0 %v3671_v48  ;;  %v4445_v34 = vld [vmem:[%s6669_s1 + $0x6a4] sm:$0xf]  ;;  %v4524_v48 = vld [vmem:[%s6669_s1 + $0xb8c] sm:$0xf0]  ;;  %v3767_v36 = vor.u32 %v4513_v31, %v3764_v32 }
 0x171   : > { %v3495_v40 = vor.u32 %v4445_v34, %v3492_v35  ;;  %v3803_v61 = vor.u32 %v4524_v48, %v3802_v45  ;;  %v3572_v34 = vld [vmem:[%s6669_s1 + $0x7f0] sm:$0xf0]  ;;  %v4497_v37 = vld [vmem:[%s6669_s1 + $0x9e4] sm:$0xf] }
 0x172   : > { %v4495_v48 = vld [vmem:[%s6669_s1 + $0x9c4] sm:$0xf] }
 0x173   : > { %1691 = vmatpush.bf16.msra.mxu3 %v3851_v54  ;;  %v794_v3 = vpop.f32.mrf.mxu1  ;;  %v3604_v54 = vld [vmem:[%s6669_s1 + $0x870] sm:$0xf0]  ;;  %v4533_v19 = vld [vmem:[%s6669_s1 + $0xc24] sm:$0xf] }
 0x174   : > { %1733 = vmatpush.bf16.msrb.mxu2 %v3535_v51  ;;  %v775_v9 = vpop.f32.mrf.mxu0  ;;  %1761 = vmatpush.bf16.msrb.mxu0 %v3663_v62  ;;  %v3796_v51 = vld [vmem:[%s6669_s1 + $0xb70] sm:$0xf0]  ;;  %v3607_v0 = vor.u32 %v4473_v53, %v3604_v54  ;;  %v4509_v53 = vld [vmem:[%s6669_s1 + $0xaa4] sm:$0xf] }
 0x175   : > { %v3799_v62 = vor.u32 %v4521_v49, %v3796_v51  ;;  %v3748_v54 = vld [vmem:[%s6669_s1 + $0xab0] sm:$0xf0] }
 0x177   : > { %1692 = vmatpush.bf16.msra.mxu3 %v3843_v4  ;;  %v3788_v4 = vld [vmem:[%s6669_s1 + $0xb50] sm:$0xf0] }
 0x178   : > { %1734 = vmatpush.bf16.msrb.mxu2 %v3527_v63  ;;  %1762 = vmatpush.bf16.msrb.mxu0 %v3655_v10  ;;  %v4505_v63 = vld [vmem:[%s6669_s1 + $0xa64] sm:$0xf] }
 0x17b   : > { %1693 = vmatpush.bf16.msra.mxu3 %v3835_v15  ;;  %v796_v24 = vpop.f32.mrf.mxu1  ;;  %v3724_v15 = vld [vmem:[%s6669_s1 + $0xa50] sm:$0xf0] }
 0x17c   : > { %1735 = vmatpush.bf16.msrb.mxu2 %v3519_v11  ;;  %v5686_v2 = vpack.c.bf16 %v796_v24, %v794_v3  ;;  %v777_v28 = vpop.f32.mrf.mxu0  ;;  %1763 = vmatpush.bf16.msrb.mxu0 %v3647_v20  ;;  %v4519_v3 = vld [vmem:[%s6669_s1 + $0xb44] sm:$0xf]  ;;  %v3716_v24 = vld [vmem:[%s6669_s1 + $0xa30] sm:$0xf0] }
 0x17d   : > { %v5694_v29 = vpack.c.bf16 %v777_v28, %v775_v9  ;;  %v3735_v9 = vor.u32 %v4505_v63, %v3732_v1  ;;  %v3791_v10 = vor.u32 %v4519_v3, %v3788_v4  ;;  %v4503_v11 = vld [vmem:[%s6669_s1 + $0xa44] sm:$0xf]  ;;  %v3719_v55 = vor.u32 %v4501_v22, %v3716_v24  ;;  %v3548_v4 = vld [vmem:[%s6669_s1 + $0x790] sm:$0xf0] }
 0x17e   : > { %1642 = vmatmul.bf16.vlgmr.msrb.gmra.mxu3 %v5686_v2  ;;  %v3727_v20 = vor.u32 %v4503_v11, %v3724_v15  ;;  %v4507_v1 = vld [vmem:[%s6669_s1 + $0xa84] sm:$0xf]  ;;  %v3676_v11 = vld [vmem:[%s6669_s1 + $0x990] sm:$0xf0] }
 0x17f   : > { %1694 = vmatpush.bf16.msra.mxu3 %v3827_v25  ;;  %1684 = vmatmul.bf16.vlgmr.msra.gmra.mxu2 %v5694_v29  ;;  %v4515_v25 = vld [vmem:[%s6669_s1 + $0xb04] sm:$0xf] }
 0x180   : > { %1736 = vmatpush.bf16.msrb.mxu2 %v3511_v21  ;;  %1712 = vmatmul.bf16.vlgmr.msra.gmra.mxu0 %v5476_v39  ;;  %v3620_v39 = vld [vmem:[%s6669_s1 + $0x8b0] sm:$0xf0]  ;;  %v3783_v21 = vor.u32 %v4517_v16, %v3780_v17  ;;  %v3775_v28 = vor.u32 %v4515_v25, %v3772_v59  ;;  %v4459_v3 = vld [vmem:[%s6669_s1 + $0x784] sm:$0xf] }
 0x181   : > { %1764 = vmatpush.bf16.msrb.mxu0 %v3639_v60  ;;  %v3623_v52 = vor.u32 %v4477_v41, %v3620_v39  ;;  %v4499_v60 = vld [vmem:[%s6669_s1 + $0xa04] sm:$0xf]  ;;  %v3756_v39 = vld [vmem:[%s6669_s1 + $0xad0] sm:$0xf0] }
 0x182   : > { %v4511_v41 = vld [vmem:[%s6669_s1 + $0xac4] sm:$0xf]  ;;  %v3852_v16 = vld [vmem:[%s6669_s1 + $0xc50] sm:$0xf0] }
 0x183   : > { %1695 = vmatpush.bf16.msra.mxu3 %v3819_v33  ;;  %v799_v42 = vpop.f32.mrf.mxu1  ;;  %v4465_v33 = vld [vmem:[%s6669_s1 + $0x7e4] sm:$0xf]  ;;  %v3759_v47 = vor.u32 %v4511_v41, %v3756_v39  ;;  %v3820_v59 = vld [vmem:[%s6669_s1 + $0xbd0] sm:$0xf0] }
 0x184   : > { %1737 = vmatpush.bf16.msrb.mxu2 %v3503_v30  ;;  %v4535_v15 = vld [vmem:[%s6669_s1 + $0xc44] sm:$0xf] }
 0x185   : > { %1765 = vmatpush.bf16.msrb.mxu0 %v3631_v38  ;;  %v3575_v38 = vor.u32 %v4465_v33, %v3572_v34  ;;  %v3855_v18 = vor.u32 %v4535_v15, %v3852_v16  ;;  %v4531_v22 = vld [vmem:[%s6669_s1 + $0xc04] sm:$0xf] }
 0x186   : > { %v4529_v24 = vld [vmem:[%s6669_s1 + $0xbe4] sm:$0xf] }
 0x187   : > { %1696 = vmatpush.bf16.msra.mxu3 %v3811_v44  ;;  %v3564_v44 = vld [vmem:[%s6669_s1 + $0x7d0] sm:$0xf0]  ;;  %v4527_v25 = vld [vmem:[%s6669_s1 + $0xbc4] sm:$0xf] }
 0x188   : > { %1738 = vmatpush.bf16.msrb.mxu2 %v3495_v40  ;;  %v3700_v40 = vld [vmem:[%s6669_s1 + $0x9f0] sm:$0xf0] }
 0x189   : > { %1766 = vmatpush.bf16.msrb.mxu0 %v3623_v52  ;;  %v3703_v46 = vor.u32 %v4497_v37, %v3700_v40  ;;  %v3692_v52 = vld [vmem:[%s6669_s1 + $0x9d0] sm:$0xf0] }
 0x18a   : > { %v3695_v58 = vor.u32 %v4495_v48, %v3692_v52 }
 0x18b   : > { %1697 = vmatpush.bf16.msra.mxu3 %v3803_v61  ;;  %v801_v8 = vpop.f32.mrf.mxu1  ;;  %v3751_v61 = vor.u32 %v4509_v53, %v3748_v54 }
 0x18c   : > { %1739 = vmatpush.bf16.msrb.mxu2 %v3487_v56  ;;  %v5774_v13 = vpack.c.bf16 %v801_v8, %v799_v42  ;;  %v4463_v42 = vld [vmem:[%s6669_s1 + $0x7c4] sm:$0xf] }
 0x18d   : > { %1767 = vmatpush.bf16.msrb.mxu0 %v3615_v5  ;;  %v3567_v51 = vor.u32 %v4463_v42, %v3564_v44  ;;  %v4461_v56 = vld [vmem:[%s6669_s1 + $0x7a4] sm:$0xf] }
 0x18e   : > { %1670 = vmatmul.bf16.vlgmr.msrb.gmra.mxu1 %v5774_v13  ;;  %v3559_v63 = vor.u32 %v4461_v56, %v3556_v57  ;;  %v4537_v5 = vld [vmem:[%s6669_s1 + $0xc64] sm:$0xf] }
 0x18f   : > { %1746 = vmatpush.bf16.msrb.mxu3 %v3607_v0  ;;  %1774 = vmatpush.bf16.msrb.mxu1 %v3735_v9  ;;  %v3684_v0 = vld [vmem:[%s6669_s1 + $0x9b0] sm:$0xf0]  ;;  %v3551_v9 = vor.u32 %v4459_v3, %v3548_v4 }
 0x190   : > { %1788 = vmatpush.bf16.msra.mxu2 %v3799_v62  ;;  %1768 = vmatmul.bf16.vlgmr.msrb.gmra.mxu0 %v5616_v50  ;;  %v3708_v50 = vld [vmem:[%s6669_s1 + $0xa10] sm:$0xf0]  ;;  %v4493_v62 = vld [vmem:[%s6669_s1 + $0x9a4] sm:$0xf] }
 0x191   : > { %1740 = vmatmul.bf16.vlgmr.msrb.gmra.mxu2 %v5539_v12  ;;  %v3580_v12 = vld [vmem:[%s6669_s1 + $0x810] sm:$0xf0]  ;;  %v3711_v35 = vor.u32 %v4499_v60, %v3708_v50  ;;  %v3687_v7 = vor.u32 %v4493_v62, %v3684_v0 }
 0x192   : > { %v3583_v30 = vor.u32 %v4467_v26, %v3580_v12  ;;  %v3823_v26 = vor.u32 %v4527_v25, %v3820_v59  ;;  %v4525_v12 = vld [vmem:[%s6669_s1 + $0xba4] sm:$0xf]  ;;  %v3804_v60 = vld [vmem:[%s6669_s1 + $0xb90] sm:$0xf0] }
 0x193   : > { %1747 = vmatpush.bf16.msrb.mxu3 %v3599_v14  ;;  %v804_v27 = vpop.f32.mrf.mxu1  ;;  %1775 = vmatpush.bf16.msrb.mxu1 %v3727_v20  ;;  %v3863_v14 = vor.u32 %v4537_v5, %v3860_v6  ;;  %v3844_v20 = vld [vmem:[%s6669_s1 + $0xc30] sm:$0xf0] }
 0x194   : > { %1789 = vmatpush.bf16.msra.mxu2 %v3791_v10  ;;  %v4491_v10 = vld [vmem:[%s6669_s1 + $0x984] sm:$0xf] }
 0x195   : > { %v3679_v17 = vor.u32 %v4491_v10, %v3676_v11 }
 0x197   : > { %1748 = vmatpush.bf16.msrb.mxu3 %v3591_v23  ;;  %1776 = vmatpush.bf16.msrb.mxu1 %v3719_v55 }
 0x198   : > { %1790 = vmatpush.bf16.msra.mxu2 %v3783_v21  ;;  %v3847_v21 = vor.u32 %v4533_v19, %v3844_v20 }
 0x19b   : > { %1749 = vmatpush.bf16.msrb.mxu3 %v3583_v30  ;;  %v806_v45 = vpop.f32.mrf.mxu1  ;;  %1777 = vmatpush.bf16.msrb.mxu1 %v3711_v35  ;;  %v3351_v35 = vld [vmem:[%s6670_s2 + $0x1] ss:$8 sm:$0x3] }
 0x19c   : > { %1791 = vmatpush.bf16.msra.mxu2 %v3775_v28  ;;  %v5851_v49 = vpack.c.bf16 %v806_v45, %v804_v27  ;;  %v3812_v27 = vld [vmem:[%s6669_s1 + $0xbb0] sm:$0xf0]  ;;  %v4523_v28 = vld [vmem:[%s6669_s1 + $0xb84] sm:$0xf]  ;;  %v948_v37 = vperm.slane %v3351_v35, 0 }
 0x19d   : > { %v3815_v55 = vor.u32 %v4525_v12, %v3812_v27  ;;  %v3807_v30 = vor.u32 %v4523_v28, %v3804_v60 }
 0x19e   : > { %1698 = vmatmul.bf16.vlgmr.msra.gmra.mxu3 %v5851_v49  ;;  %1726 = vmatmul.bf16.vlgmr.msra.gmra.mxu1 %v5605_v43  ;;  %v3740_v43 = vld [vmem:[%s6669_s1 + $0xa90] sm:$0xf0] }
 0x19f   : > { %1750 = vmatpush.bf16.msrb.mxu3 %v3575_v38  ;;  %1778 = vmatpush.bf16.msrb.mxu1 %v3703_v46  ;;  %v3743_v8 = vor.u32 %v4507_v1, %v3740_v43 }
 0x1a0   : > { %1792 = vmatpush.bf16.msra.mxu2 %v3767_v36 }
 0x1a3   : > { %1751 = vmatpush.bf16.msrb.mxu3 %v3567_v51  ;;  %1779 = vmatpush.bf16.msrb.mxu1 %v3695_v58 }
 0x1a4   : > { %1793 = vmatpush.bf16.msra.mxu2 %v3759_v47 }
 0x1a7   : > { %1752 = vmatpush.bf16.msrb.mxu3 %v3559_v63  ;;  %1780 = vmatpush.bf16.msrb.mxu1 %v3687_v7 }
 0x1a8   : > { %1794 = vmatpush.bf16.msra.mxu2 %v3751_v61 }
 0x1ab   : > { %1753 = vmatpush.bf16.msrb.mxu3 %v3551_v9  ;;  %1781 = vmatpush.bf16.msrb.mxu1 %v3679_v17  ;;  %v4539_v9 = vld [vmem:[%s6669_s1 + $0xc8c] sm:$0xf0]  ;;  %v949_v17 = vperm.slane %v3351_v35, 1 }
 0x1ac   : > { %1795 = vmatpush.bf16.msra.mxu2 %v3743_v8  ;;  %v3866_v8 = vld [vmem:[%s6669_s1 + $0xc80] sm:$0xf]  ;;  %v4541_v35 = vld [vmem:[%s6669_s1 + $0xccc] sm:$0xf0] }
 0x1ae   : > { %1754 = vmatmul.bf16.vlgmr.msrb.gmra.mxu3 %v5686_v2  ;;  %1782 = vmatmul.bf16.vlgmr.msrb.gmra.mxu1 %v5774_v13  ;;  %v3828_v2 = vld [vmem:[%s6669_s1 + $0xbf0] sm:$0xf0] }
 0x1af   : > { %1802 = vmatpush.bf16.msra.mxu3 %v3863_v14  ;;  %1796 = vmatmul.bf16.vlgmr.msra.gmra.mxu2 %v5694_v29  ;;  %v3836_v29 = vld [vmem:[%s6669_s1 + $0xc10] sm:$0xf0]  ;;  %v3831_v13 = vor.u32 %v4529_v24, %v3828_v2  ;;  %v3867_v14 = vor.u32 %v4539_v9, %v3866_v8  ;;  %v4557_v8 = vld [vmem:[%s6669_s1 + $0xecc] sm:$0xf0]  ;;  %v3892_v9 = vld [vmem:[%s6669_s1 + $0xd20] sm:$0xf] }
 0x1b0   : > { %v3839_v23 = vor.u32 %v4531_v22, %v3836_v29  ;;  %v4540_v22 = vld [vmem:[%s6669_s1 + $0xcac] sm:$0xf0] }
 0x1b3   : > { %1803 = vmatpush.bf16.msra.mxu3 %v3855_v18 }
 0x1b7   : > { %1804 = vmatpush.bf16.msra.mxu3 %v3847_v21  ;;  %v3870_v21 = vld [vmem:[%s6669_s1 + $0xca0] sm:$0xf] }
 0x1bb   : > { %1805 = vmatpush.bf16.msra.mxu3 %v3839_v23 }
 0x1bf   : > { %1806 = vmatpush.bf16.msra.mxu3 %v3831_v13  ;;  %v3871_v13 = vor.u32 %v4540_v22, %v3870_v21  ;;  %v4543_v22 = vld [vmem:[%s6669_s1 + $0xd0c] sm:$0xf0] }
 0x1c3   : > { %1807 = vmatpush.bf16.msra.mxu3 %v3823_v26 }
 0x1c7   : > { %1808 = vmatpush.bf16.msra.mxu3 %v3815_v55 }
 0x1cb   : > { %1809 = vmatpush.bf16.msra.mxu3 %v3807_v30 }
 0x1ce   : > { %1810 = vmatmul.bf16.vlgmr.msra.gmra.mxu3 %v5851_v49 }
 0x1d2   : > { %v1601_v50 = vpop.f32.mrf.mxu2 }
 0x1d3   : > { %v1602_v40 = vadd.f32 %v1601_v50, %v948_v37 }
 0x1da   : > { %v1603_v32 = vpop.f32.mrf.mxu2 }
 0x1db   : > { %v1604_v41 = vadd.f32 %v1603_v32, %v948_v37 }
 0x1e2   : > { %v1629_v34 = vpop.f32.mrf.mxu2 }
 0x1ea   : > { %v1631_v38 = vpop.f32.mrf.mxu2 }
 0x1ec   : > { %v1657_v39 = vpop.f32.mrf.mxu0 }
 0x1f1   : > { %v1615_v31 = vpop.f32.mrf.mxu3 }
 0x1f2   : > { %v1616_v42 = vadd.f32 %v1615_v31, %v1602_v40 }
 0x1f4   : > { %v1630_v47 = vadd.f32 %v1629_v34, %v1616_v42  ;;  %v1659_v53 = vpop.f32.mrf.mxu0  ;;  %v3874_v34 = vld [vmem:[%s6669_s1 + $0xcc0] sm:$0xf] }
 0x1f9   : > { %v1617_v33 = vpop.f32.mrf.mxu3 }
 0x1fa   : > { %v1618_v45 = vadd.f32 %v1617_v33, %v1604_v41 }
 0x1fc   : > { %v1632_v48 = vadd.f32 %v1631_v38, %v1618_v45  ;;  %v3875_v38 = vor.u32 %v4541_v35, %v3874_v34  ;;  %v3960_v34 = vld [vmem:[%s6669_s1 + $0xf40] sm:$0xf]  ;;  %v4561_v35 = vld [vmem:[%s6669_s1 + $0xf4c] sm:$0xf0] }
 0x1fd   : > { %v1713_v5 = vpop.f32.mrf.mxu0 }
 0x1fe   : > { %v1714_v20 = vadd.f32 %v1713_v5, %v949_v17  ;;  %v4545_v5 = vld [vmem:[%s6669_s1 + $0xd4c] sm:$0xf0] }
 0x201   : > { %v1643_v36 = vpop.f32.mrf.mxu3 }
 0x202   : > { %v1644_v49 = vadd.f32 %v1643_v36, %v1630_v47  ;;  %v1685_v51 = vpop.f32.mrf.mxu2 }
 0x204   : > { %v1658_v54 = vadd.f32 %v1657_v39, %v1644_v49  ;;  %v3912_v49 = vld [vmem:[%s6669_s1 + $0xdc0] sm:$0xf] }
 0x205   : > { %v1715_v15 = vpop.f32.mrf.mxu0 }
 0x206   : > { %v1716_v29 = vadd.f32 %v1715_v15, %v949_v17  ;;  %v4564_v15 = vld [vmem:[%s6669_s1 + $0xfac] sm:$0xf0] }
 0x209   : > { %v1645_v46 = vpop.f32.mrf.mxu3 }
 0x20a   : > { %v1646_v52 = vadd.f32 %v1645_v46, %v1632_v48  ;;  %v1687_v0 = vpop.f32.mrf.mxu2 }
 0x20b   : > { %v1671_v44 = vpop.f32.mrf.mxu1 }
 0x20c   : > { %v1672_v58 = vadd.f32 %v1671_v44, %v1658_v54  ;;  %v1660_v61 = vadd.f32 %v1659_v53, %v1646_v52  ;;  %v3908_v52 = vld [vmem:[%s6669_s1 + $0xda0] sm:$0xf]  ;;  %v4548_v54 = vld [vmem:[%s6669_s1 + $0xdac] sm:$0xf0] }
 0x20d   : > { %v1769_v24 = vpop.f32.mrf.mxu0 }
 0x20e   : > { %v1686_v63 = vadd.f32 %v1685_v51, %v1672_v58  ;;  %v4549_v51 = vld [vmem:[%s6669_s1 + $0xdcc] sm:$0xf0] }
 0x20f   : > { %v3913_v53 = vor.u32 %v4549_v51, %v3912_v49  ;;  %v4565_v58 = vld [vmem:[%s6669_s1 + $0xfcc] sm:$0xf0] }
 0x210   : > { %v4560_v49 = vld [vmem:[%s6669_s1 + $0xf2c] sm:$0xf0] }
 0x211   : > { %2291 = vmatpush.bf16.msrb.mxu2 %v3913_v53  ;;  %v3924_v53 = vld [vmem:[%s6669_s1 + $0xe20] sm:$0xf] }
 0x213   : > { %v1673_v56 = vpop.f32.mrf.mxu1 }
 0x214   : > { %v1674_v62 = vadd.f32 %v1673_v56, %v1660_v61  ;;  %v1741_v16 = vpop.f32.mrf.mxu2  ;;  %v3909_v56 = vor.u32 %v4548_v54, %v3908_v52  ;;  %v3904_v61 = vld [vmem:[%s6669_s1 + $0xd80] sm:$0xf]  ;;  %v4552_v54 = vld [vmem:[%s6669_s1 + $0xe2c] sm:$0xf0] }
 0x215   : > { %v1771_v50 = vpop.f32.mrf.mxu0 }
 0x216   : > { %v1688_v43 = vadd.f32 %v1687_v0, %v1674_v62  ;;  %v4547_v62 = vld [vmem:[%s6669_s1 + $0xd8c] sm:$0xf0]  ;;  %2292 = vmatpush.bf16.msrb.mxu2 %v3909_v56  ;;  %v4004_v56 = vld [vmem:[%s6669_s1 + $0x10a0] sm:$0xf] }
 0x217   : > { %v3905_v0 = vor.u32 %v4547_v62, %v3904_v61  ;;  %v4572_v61 = vld [vmem:[%s6669_s1 + $0x10ac] sm:$0xf0]  ;;  %v4032_v62 = vld [vmem:[%s6669_s1 + $0x1180] sm:$0xf] }
 0x21a   : > { %2293 = vmatpush.bf16.msrb.mxu2 %v3905_v0 }
 0x21b   : > { %v1727_v11 = vpop.f32.mrf.mxu1 }
 0x21c   : > { %v1728_v23 = vadd.f32 %v1727_v11, %v1714_v20  ;;  %v1743_v2 = vpop.f32.mrf.mxu2  ;;  %v4544_v11 = vld [vmem:[%s6669_s1 + $0xd2c] sm:$0xf0]  ;;  %v3888_v20 = vld [vmem:[%s6669_s1 + $0xd00] sm:$0xf] }
 0x21e   : > { %v1742_v59 = vadd.f32 %v1741_v16, %v1728_v23  ;;  %v3893_v16 = vor.u32 %v4544_v11, %v3892_v9  ;;  %v4563_v23 = vld [vmem:[%s6669_s1 + $0xf8c] sm:$0xf0]  ;;  %v4028_v11 = vld [vmem:[%s6669_s1 + $0x1160] sm:$0xf] }
 0x221   : > { %v1699_v57 = vpop.f32.mrf.mxu3 }
 0x222   : > { %v1700_v1 = vadd.f32 %v1699_v57, %v1686_v63  ;;  %v3976_v57 = vld [vmem:[%s6669_s1 + $0xfc0] sm:$0xf] }
 0x223   : > { %v1729_v18 = vpop.f32.mrf.mxu1  ;;  %v3977_v63 = vor.u32 %v4565_v58, %v3976_v57  ;;  %v3925_v58 = vor.u32 %v4552_v54, %v3924_v53  ;;  %v3980_v54 = vld [vmem:[%s6669_s1 + $0xfe0] sm:$0xf] }
 0x224   : > { %v1816_v6 = vmax.f32 %v1700_v1, 0.0  ;;  %v1730_v25 = vadd.f32 %v1729_v18, %v1716_v29  ;;  %v3900_v1 = vld [vmem:[%s6669_s1 + $0xd60] sm:$0xf] }
 0x225   : > { %v3940_v18 = vld [vmem:[%s6669_s1 + $0xea0] sm:$0xf] }
 0x226   : > { %v1744_v55 = vadd.f32 %v1743_v2, %v1730_v25  ;;  %v3968_v29 = vld [vmem:[%s6669_s1 + $0xf80] sm:$0xf]  ;;  %v4555_v25 = vld [vmem:[%s6669_s1 + $0xe8c] sm:$0xf0] }
 0x227   : > { %v3969_v2 = vor.u32 %v4563_v23, %v3968_v29 }
 0x229   : > { %v1701_v3 = vpop.f32.mrf.mxu3 }
 0x22a   : > { %v1702_v4 = vadd.f32 %v1701_v3, %v1688_v43  ;;  %v4546_v43 = vld [vmem:[%s6669_s1 + $0xd6c] sm:$0xf0] }
 0x22b   : > { %v1783_v26 = vpop.f32.mrf.mxu1  ;;  %v3901_v3 = vor.u32 %v4546_v43, %v3900_v1  ;;  %v4005_v1 = vor.u32 %v4572_v61, %v4004_v56  ;;  %v4566_v56 = vld [vmem:[%s6669_s1 + $0xfec] sm:$0xf0] }
 0x22c   : > { %v1818_v7 = vmax.f32 %v1702_v4, 0.0  ;;  %v3896_v4 = vld [vmem:[%s6669_s1 + $0xd40] sm:$0xf]  ;;  %v3981_v61 = vor.u32 %v4566_v56, %v3980_v54 }
 0x22d   : > { %2294 = vmatpush.bf16.msrb.mxu2 %v3901_v3  ;;  %v3952_v3 = vld [vmem:[%s6669_s1 + $0xf00] sm:$0xf] }
 0x22e   : > { %v1820_v10 = vpack.c.bf16 %v1818_v7, %v1816_v6  ;;  %v3897_v6 = vor.u32 %v4545_v5, %v3896_v4  ;;  %v3944_v7 = vld [vmem:[%s6669_s1 + $0xec0] sm:$0xf]  ;;  %v4559_v4 = vld [vmem:[%s6669_s1 + $0xf0c] sm:$0xf0] }
 0x22f   : > { %v3953_v5 = vor.u32 %v4559_v4, %v3952_v3  ;;  %v4052_v3 = vld [vmem:[%s6669_s1 + $0x1220] sm:$0xf]  ;;  %v4584_v4 = vld [vmem:[%s6669_s1 + $0x122c] sm:$0xf0] }
 0x230   : > { %1859 = vmatpush.bf16.msra.mxu0 %v1820_v10  ;;  %v3945_v10 = vor.u32 %v4557_v8, %v3944_v7  ;;  %v4551_v7 = vld [vmem:[%s6669_s1 + $0xe0c] sm:$0xf0]  ;;  %v4000_v8 = vld [vmem:[%s6669_s1 + $0x1080] sm:$0xf] }
 0x231   : > { %v1755_v19 = vpop.f32.mrf.mxu3  ;;  %2295 = vmatpush.bf16.msrb.mxu2 %v3897_v6  ;;  %v3920_v6 = vld [vmem:[%s6669_s1 + $0xe00] sm:$0xf] }
 0x232   : > { %v1756_v27 = vadd.f32 %v1755_v19, %v1742_v59  ;;  %v1797_v60 = vpop.f32.mrf.mxu2  ;;  %v4556_v19 = vld [vmem:[%s6669_s1 + $0xeac] sm:$0xf0]  ;;  %2305 = vmatpush.bf16.msrb.mxu3 %v3945_v10  ;;  %v3884_v59 = vld [vmem:[%s6669_s1 + $0xce0] sm:$0xf]  ;;  %v3921_v9 = vor.u32 %v4551_v7, %v3920_v6  ;;  %v4053_v6 = vor.u32 %v4584_v4, %v4052_v3  ;;  %v4156_v4 = vld [vmem:[%s6669_s1 + $0x1398] sm:$0xf0] }
 0x233   : > { %3876 = vmatmul.msk.bf16.vlgmr.msra.gmra.mxu0 %vm738_vm0, %v3867_v14  ;;  %v1785_v36 = vpop.f32.mrf.mxu1  ;;  %v3941_v21 = vor.u32 %v4556_v19, %v3940_v18  ;;  %v4571_v10 = vld [vmem:[%s6669_s1 + $0x108c] sm:$0xf0]  ;;  %v4146_v56 = vld [vmem:[%s6669_s1 + $0x1380] sm:$0xf] }
 0x234   : > { %v1770_v30 = vadd.f32 %v1769_v24, %v1756_v27  ;;  %2319 = vmatpush.bf16.msrb.mxu0 %v3977_v63  ;;  %v3889_v24 = vor.u32 %v4543_v22, %v3888_v20  ;;  %v3964_v27 = vld [vmem:[%s6669_s1 + $0xf60] sm:$0xf]  ;;  %v4579_v63 = vld [vmem:[%s6669_s1 + $0x118c] sm:$0xf0] }
 0x235   : > { %2296 = vmatpush.bf16.msrb.mxu2 %v3893_v16  ;;  %v4033_v43 = vor.u32 %v4579_v63, %v4032_v62  ;;  %v4558_v18 = vld [vmem:[%s6669_s1 + $0xeec] sm:$0xf0]  ;;  %v3916_v20 = vld [vmem:[%s6669_s1 + $0xde0] sm:$0xf] }
 0x236   : > { %v1784_v33 = vadd.f32 %v1783_v26, %v1770_v30  ;;  %2306 = vmatpush.bf16.msrb.mxu3 %v3941_v21  ;;  %v3932_v30 = vld [vmem:[%s6669_s1 + $0xe60] sm:$0xf]  ;;  %v4550_v21 = vld [vmem:[%s6669_s1 + $0xdec] sm:$0xf0] }
 0x237   : > { %v3996_v22 = vld [vmem:[%s6669_s1 + $0x1060] sm:$0xf]  ;;  %v3917_v23 = vor.u32 %v4550_v21, %v3916_v20  ;;  %v4586_v62 = vld [vmem:[%s6669_s1 + $0x126c] sm:$0xf0] }
 0x238   : > { %v1798_v40 = vadd.f32 %v1797_v60, %v1784_v33  ;;  %v4581_v33 = vld [vmem:[%s6669_s1 + $0x11cc] sm:$0xf0] }
 0x239   : > { %v1757_v12 = vpop.f32.mrf.mxu3  ;;  %2297 = vmatpush.bf16.msrb.mxu2 %v3889_v24  ;;  %v4570_v24 = vld [vmem:[%s6669_s1 + $0x106c] sm:$0xf0] }
 0x23a   : > { %v1758_v28 = vadd.f32 %v1757_v12, %v1744_v55  ;;  %v1799_v41 = vpop.f32.mrf.mxu2  ;;  %v4542_v12 = vld [vmem:[%s6669_s1 + $0xcec] sm:$0xf0] }
 0x23b   : > { %v4562_v55 = vld [vmem:[%s6669_s1 + $0xf6c] sm:$0xf0] }
 0x23c   : > { %v1772_v31 = vadd.f32 %v1771_v50, %v1758_v28  ;;  %v3885_v28 = vor.u32 %v4542_v12, %v3884_v59  ;;  %v3965_v60 = vor.u32 %v4562_v55, %v3964_v27  ;;  %v4554_v50 = vld [vmem:[%s6669_s1 + $0xe6c] sm:$0xf0]  ;;  %v4020_v27 = vld [vmem:[%s6669_s1 + $0x1120] sm:$0xf] }
 0x23d   : > { %v4569_v12 = vld [vmem:[%s6669_s1 + $0x104c] sm:$0xf0] }
 0x23e   : > { %v1786_v37 = vadd.f32 %v1785_v36, %v1772_v31  ;;  %v4040_v31 = vld [vmem:[%s6669_s1 + $0x11c0] sm:$0xf]  ;;  %2298 = vmatpush.bf16.msrb.mxu2 %v3885_v28  ;;  %v4576_v28 = vld [vmem:[%s6669_s1 + $0x112c] sm:$0xf0] }
 0x23f   : > { %v4041_v36 = vor.u32 %v4581_v33, %v4040_v31  ;;  %v4568_v33 = vld [vmem:[%s6669_s1 + $0x102c] sm:$0xf0] }
 0x240   : > { %v1800_v42 = vadd.f32 %v1799_v41, %v1786_v37  ;;  %v3961_v37 = vor.u32 %v4561_v35, %v3960_v34  ;;  %v4008_v41 = vld [vmem:[%s6669_s1 + $0x10c0] sm:$0xf] }
 0x241   : > { %v4016_v34 = vld [vmem:[%s6669_s1 + $0x1100] sm:$0xf] }
 0x242   : > { %2347 = vmatpush.bf16.msra.mxu2 %v4041_v36 }
 0x243   : > { %3877 = vmatmul.msk.bf16.gmra.mxu0 %vm738_vm0, %v3871_v13 }
 0x251   : > { %v1811_v32 = vpop.f32.mrf.mxu3 }
 0x252   : > { %v1812_v39 = vadd.f32 %v1811_v32, %v1798_v40  ;;  %v3933_v32 = vor.u32 %v4554_v50, %v3932_v30  ;;  %v4553_v40 = vld [vmem:[%s6669_s1 + $0xe4c] sm:$0xf0]  ;;  %v4021_v50 = vor.u32 %v4576_v28, %v4020_v27  ;;  %v4622_v27 = vld [vmem:[%s6669_s1 + $0x13f4] sm:$0xf0]  ;;  %v4620_v28 = vld [vmem:[%s6669_s1 + $0x13ec] sm:$0xf] }
 0x253   : > { %3878 = vmatmul.msk.bf16.gmra.mxu0 %vm738_vm0, %v3875_v38  ;;  %v4589_v30 = vld [vmem:[%s6669_s1 + $0x12cc] sm:$0xf0] }
 0x254   : > { %v1817_v46 = vmax.f32 %v1812_v39, 0.0 }
 0x259   : > { %v1813_v44 = vpop.f32.mrf.mxu3 }
 0x25a   : > { %v1814_v45 = vadd.f32 %v1813_v44, %v1800_v42  ;;  %v4573_v42 = vld [vmem:[%s6669_s1 + $0x10cc] sm:$0xf0]  ;;  %v4036_v44 = vld [vmem:[%s6669_s1 + $0x11a0] sm:$0xf] }
 0x25c   : > { %v1819_v47 = vmax.f32 %v1814_v45, 0.0  ;;  %v4580_v45 = vld [vmem:[%s6669_s1 + $0x11ac] sm:$0xf0] }
 0x25e   : > { %v1821_v48 = vpack.c.bf16 %v1819_v47, %v1817_v46  ;;  %v4009_v46 = vor.u32 %v4573_v42, %v4008_v41  ;;  %v4037_v47 = vor.u32 %v4580_v45, %v4036_v44  ;;  %v3984_v44 = vld [vmem:[%s6669_s1 + $0x1000] sm:$0xf]  ;;  %v4567_v45 = vld [vmem:[%s6669_s1 + $0x100c] sm:$0xf0] }
 0x260   : > { %1883 = vmatpush.bf16.msra.mxu1 %v1821_v48  ;;  %v3956_v48 = vld [vmem:[%s6669_s1 + $0xf20] sm:$0xf]  ;;  %2348 = vmatpush.bf16.msra.mxu2 %v4037_v47  ;;  %v3985_v47 = vor.u32 %v4567_v45, %v3984_v44 }
 0x261   : > { %v3957_v51 = vor.u32 %v4560_v49, %v3956_v48  ;;  %v4574_v48 = vld [vmem:[%s6669_s1 + $0x10ec] sm:$0xf0]  ;;  %v4064_v49 = vld [vmem:[%s6669_s1 + $0x1280] sm:$0xf] }
 0x263   : > { %3879 = vmatmul.msk.bf16.vlgmr.msra.gmra.mxu1 %vm738_vm0, %v3867_v14  ;;  %v3972_v14 = vld [vmem:[%s6669_s1 + $0xfa0] sm:$0xf] }
 0x264   : > { %v3973_v17 = vor.u32 %v4564_v15, %v3972_v14  ;;  %2333 = vmatpush.bf16.msrb.mxu1 %v4009_v46  ;;  %v4578_v14 = vld [vmem:[%s6669_s1 + $0x116c] sm:$0xf0]  ;;  %2349 = vmatpush.bf16.msra.mxu2 %v4033_v43  ;;  %v4001_v15 = vor.u32 %v4571_v10, %v4000_v8  ;;  %v4012_v46 = vld [vmem:[%s6669_s1 + $0x10e0] sm:$0xf] }
 0x265   : > { %v4029_v16 = vor.u32 %v4578_v14, %v4028_v11  ;;  %v4583_v10 = vld [vmem:[%s6669_s1 + $0x120c] sm:$0xf0]  ;;  %v4044_v14 = vld [vmem:[%s6669_s1 + $0x11e0] sm:$0xf] }
 0x266   : > { %2320 = vmatpush.bf16.msrb.mxu0 %v3973_v17  ;;  %v3948_v17 = vld [vmem:[%s6669_s1 + $0xee0] sm:$0xf] }
 0x267   : > { %v3949_v19 = vor.u32 %v4558_v18, %v3948_v17 }
 0x268   : > { %2334 = vmatpush.bf16.msrb.mxu1 %v4005_v1  ;;  %2350 = vmatpush.bf16.msra.mxu2 %v4029_v16  ;;  %v4585_v1 = vld [vmem:[%s6669_s1 + $0x124c] sm:$0xf0] }
 0x26a   : > { %2321 = vmatpush.bf16.msrb.mxu0 %v3969_v2  ;;  %v4024_v2 = vld [vmem:[%s6669_s1 + $0x1140] sm:$0xf] }
 0x26c   : > { %2335 = vmatpush.bf16.msrb.mxu1 %v4001_v15  ;;  %v4582_v15 = vld [vmem:[%s6669_s1 + $0x11ec] sm:$0xf0] }
 0x26d   : > { %v4045_v16 = vor.u32 %v4582_v15, %v4044_v14  ;;  %v4138_v15 = vld [vmem:[%s6669_s1 + $0x1368] sm:$0xf] }
 0x26e   : > { %2322 = vmatpush.bf16.msrb.mxu0 %v3965_v60  ;;  %v4072_v60 = vld [vmem:[%s6669_s1 + $0x12c0] sm:$0xf] }
 0x26f   : > { %v4073_v31 = vor.u32 %v4589_v30, %v4072_v60  ;;  %v4204_v60 = vld [vmem:[%s6669_s1 + $0x13f8] sm:$0xf0]  ;;  %v4178_v30 = vld [vmem:[%s6669_s1 + $0x13c0] sm:$0xf] }
 0x272   : > { %2323 = vmatpush.bf16.msrb.mxu0 %v3961_v37  ;;  %v4575_v37 = vld [vmem:[%s6669_s1 + $0x110c] sm:$0xf0] }
 0x273   : > { %3880 = vmatmul.msk.bf16.gmra.mxu1 %vm738_vm0, %v3871_v13  ;;  %v3936_v13 = vld [vmem:[%s6669_s1 + $0xe80] sm:$0xf] }
 0x274   : > { %v3937_v26 = vor.u32 %v4555_v25, %v3936_v13  ;;  %v4577_v13 = vld [vmem:[%s6669_s1 + $0x114c] sm:$0xf0]  ;;  %v3997_v25 = vor.u32 %v4570_v24, %v3996_v22 }
 0x275   : > { %v4025_v59 = vor.u32 %v4577_v13, %v4024_v2 }
 0x276   : > { %2307 = vmatpush.bf16.msrb.mxu3 %v3937_v26  ;;  %2324 = vmatpush.bf16.msrb.mxu0 %v3957_v51  ;;  %v3992_v26 = vld [vmem:[%s6669_s1 + $0x1040] sm:$0xf]  ;;  %v4587_v51 = vld [vmem:[%s6669_s1 + $0x128c] sm:$0xf0] }
 0x277   : > { %2336 = vmatpush.bf16.msrb.mxu1 %v3997_v25  ;;  %2351 = vmatpush.bf16.msra.mxu2 %v4025_v59  ;;  %v3993_v55 = vor.u32 %v4569_v12, %v3992_v26  ;;  %v4065_v53 = vor.u32 %v4587_v51, %v4064_v49  ;;  %v4194_v25 = vld [vmem:[%s6669_s1 + $0x13e0] sm:$0xf]  ;;  %v4621_v59 = vld [vmem:[%s6669_s1 + $0x13ec] sm:$0xf0]  ;;  %v4202_v12 = vld [vmem:[%s6669_s1 + $0x13e8] sm:$0xf] }
 0x278   : > { %v4195_v26 = vor.u32 %v4621_v59, %v4194_v25  ;;  %v4614_v49 = vld [vmem:[%s6669_s1 + $0x13b4] sm:$0xf0]  ;;  %v4612_v51 = vld [vmem:[%s6669_s1 + $0x13ac] sm:$0xf] }
 0x27a   : > { %2308 = vmatpush.bf16.msrb.mxu3 %v3933_v32  ;;  %2325 = vmatpush.bf16.msrb.mxu0 %v3953_v5  ;;  %v3988_v32 = vld [vmem:[%s6669_s1 + $0x1020] sm:$0xf] }
 0x27b   : > { %2337 = vmatpush.bf16.msrb.mxu1 %v3993_v55  ;;  %2352 = vmatpush.bf16.msra.mxu2 %v4021_v50  ;;  %v3989_v36 = vor.u32 %v4568_v33, %v3988_v32  ;;  %v4203_v55 = vor.u32 %v4622_v27, %v4202_v12  ;;  %v2002_v50 = vld [vmem:[%s6670_s2 + $0x2] ss:$0 sm:$0xff]  ;;  %v4207_v32 = vor.u32 %v4620_v28, %v4204_v60  ;;  %v4617_v33 = vld [vmem:[%s6669_s1 + $0x13cc] sm:$0xf0]  ;;  %v4619_v12 = vld [vmem:[%s6669_s1 + $0x13e4] sm:$0xf] }
 0x27c   : > { %v4196_v27 = vld [vmem:[%s6669_s1 + $0x13f0] sm:$0xf0]  ;;  %v4076_v60 = vld [vmem:[%s6669_s1 + $0x12e0] sm:$0xf] }
 0x27e   : > { %2326 = vmatpush.bf16.msrb.mxu0 %v3949_v19 }
 0x27f   : > { %2338 = vmatpush.bf16.msrb.mxu1 %v3989_v36  ;;  %v4186_v36 = vld [vmem:[%s6669_s1 + $0x13c8] sm:$0xf] }
 0x283   : > { %3881 = vmatmul.msk.bf16.gmra.mxu1 %vm738_vm0, %v3875_v38  ;;  %v3928_v38 = vld [vmem:[%s6669_s1 + $0xe40] sm:$0xf] }
 0x284   : > { %v3929_v39 = vor.u32 %v4553_v40, %v3928_v38  ;;  %v4068_v38 = vld [vmem:[%s6669_s1 + $0x12a0] sm:$0xf]  ;;  %v4588_v40 = vld [vmem:[%s6669_s1 + $0x12ac] sm:$0xf0]  ;;  %2339 = vmatpush.bf16.msrb.mxu1 %v3985_v47 }
 0x285   : > { %v4069_v42 = vor.u32 %v4588_v40, %v4068_v38  ;;  %v4616_v38 = vld [vmem:[%s6669_s1 + $0x13cc] sm:$0xf] }
 0x286   : > { %2309 = vmatpush.bf16.msrb.mxu3 %v3929_v39  ;;  %v4017_v39 = vor.u32 %v4575_v37, %v4016_v34  ;;  %v4618_v37 = vld [vmem:[%s6669_s1 + $0x13d4] sm:$0xf0] }
 0x287   : > { %v4187_v40 = vor.u32 %v4618_v37, %v4186_v36  ;;  %v4611_v36 = vld [vmem:[%s6669_s1 + $0x13a4] sm:$0xf]  ;;  %v4164_v37 = vld [vmem:[%s6669_s1 + $0x13b0] sm:$0xf0] }
 0x288   : > { %2353 = vmatpush.bf16.msra.mxu2 %v4017_v39  ;;  %2340 = vmatpush.bf16.msrb.mxu1 %v3981_v61  ;;  %v4162_v39 = vld [vmem:[%s6669_s1 + $0x13a0] sm:$0xf] }
 0x28a   : > { %2310 = vmatpush.bf16.msrb.mxu3 %v3925_v58 }
 0x28c   : > { %2606 = vmatpush.bf16.msra.mxu1 %v4195_v26 }
 0x28e   : > { %2311 = vmatpush.bf16.msrb.mxu3 %v3921_v9  ;;  %v4048_v9 = vld [vmem:[%s6669_s1 + $0x1200] sm:$0xf] }
 0x28f   : > { %v4049_v11 = vor.u32 %v4583_v10, %v4048_v9 }
 0x292   : > { %2312 = vmatpush.bf16.msrb.mxu3 %v3917_v23 }
 0x296   : > { %2361 = vmatpush.bf16.msra.mxu3 %v4073_v31 }
 0x29a   : > { %2362 = vmatpush.bf16.msra.mxu3 %v4069_v42  ;;  %v4613_v42 = vld [vmem:[%s6669_s1 + $0x13ac] sm:$0xf0] }
 0x29e   : > { %2363 = vmatpush.bf16.msra.mxu3 %v4065_v53 }
 0x2b0   : > { %v1861_v52 = vpop.f32.mrf.mxu0 }
 0x2b8   : > { %v1863_v57 = vpop.f32.mrf.mxu0 }
 0x2b9   : > { %v1900_v0 = vpack.c.bf16 %v1863_v57, %v1861_v52  ;;  %v4013_v52 = vor.u32 %v4574_v48, %v4012_v46  ;;  %v4060_v57 = vld [vmem:[%s6669_s1 + $0x1260] sm:$0xf]  ;;  %v4170_v46 = vld [vmem:[%s6669_s1 + $0x13a8] sm:$0xf]  ;;  %v4163_v48 = vor.u32 %v4613_v42, %v4162_v39  ;;  %v4603_v42 = vld [vmem:[%s6669_s1 + $0x1364] sm:$0xf] }
 0x2ba   : > { %v4061_v63 = vor.u32 %v4586_v62, %v4060_v57  ;;  %v4171_v54 = vor.u32 %v4614_v49, %v4170_v46  ;;  %v4609_v57 = vld [vmem:[%s6669_s1 + $0x138c] sm:$0xf0]  ;;  %v4114_v46 = vld [vmem:[%s6669_s1 + $0x1340] sm:$0xf] }
 0x2bb   : > { %2299 = vmatmul.bf16.vlgmr.msrb.gmra.mxu2 %v1900_v0  ;;  %v4056_v0 = vld [vmem:[%s6669_s1 + $0x1240] sm:$0xf]  ;;  %v4147_v3 = vor.u32 %v4609_v57, %v4146_v56  ;;  %v4600_v57 = vld [vmem:[%s6669_s1 + $0x134c] sm:$0xf] }
 0x2bc   : > { %2354 = vmatpush.bf16.msra.mxu2 %v4013_v52  ;;  %2364 = vmatpush.bf16.msra.mxu3 %v4061_v63  ;;  %v4057_v43 = vor.u32 %v4585_v1, %v4056_v0  ;;  %v4172_v52 = vld [vmem:[%s6669_s1 + $0x13b8] sm:$0xf0]  ;;  %v4154_v63 = vld [vmem:[%s6669_s1 + $0x1388] sm:$0xf]  ;;  %v4610_v0 = vld [vmem:[%s6669_s1 + $0x1394] sm:$0xf0] }
 0x2bd   : > { %v4175_v62 = vor.u32 %v4612_v51, %v4172_v52  ;;  %v4608_v1 = vld [vmem:[%s6669_s1 + $0x138c] sm:$0xf]  ;;  %v4116_v51 = vld [vmem:[%s6669_s1 + $0x1350] sm:$0xf0]  ;;  %v4122_v52 = vld [vmem:[%s6669_s1 + $0x1348] sm:$0xf] }
 0x2be   : > { %v4159_v10 = vor.u32 %v4608_v1, %v4156_v4  ;;  %v4598_v4 = vld [vmem:[%s6669_s1 + $0x1334] sm:$0xf0] }
 0x2c0   : > { %v1866_v29 = vpop.f32.mrf.mxu0  ;;  %2365 = vmatpush.bf16.msra.mxu3 %v4057_v43  ;;  %2634 = vmatpush.bf16.msrb.mxu2 %v4203_v55 }
 0x2c4   : > { %2366 = vmatpush.bf16.msra.mxu3 %v4053_v6  ;;  %2635 = vmatpush.bf16.msrb.mxu2 %v4187_v40  ;;  %v4130_v6 = vld [vmem:[%s6669_s1 + $0x1360] sm:$0xf]  ;;  %v4607_v40 = vld [vmem:[%s6669_s1 + $0x1384] sm:$0xf] }
 0x2c8   : > { %v1868_v35 = vpop.f32.mrf.mxu0  ;;  %2367 = vmatpush.bf16.msra.mxu3 %v4049_v11  ;;  %2636 = vmatpush.bf16.msrb.mxu2 %v4171_v54 }
 0x2c9   : > { %v1902_v41 = vpack.c.bf16 %v1868_v35, %v1866_v29  ;;  %v4179_v35 = vor.u32 %v4617_v33, %v4178_v30  ;;  %v4590_v30 = vld [vmem:[%s6669_s1 + $0x12ec] sm:$0xf0]  ;;  %v4180_v33 = vld [vmem:[%s6669_s1 + $0x13d0] sm:$0xf0] }
 0x2cb   : > { %2327 = vmatmul.bf16.vlgmr.msrb.gmra.mxu0 %v1902_v41  ;;  %v4188_v41 = vld [vmem:[%s6669_s1 + $0x13d8] sm:$0xf0]  ;;  %2607 = vmatpush.bf16.msra.mxu1 %v4179_v35 }
 0x2cc   : > { %2368 = vmatpush.bf16.msra.mxu3 %v4045_v16  ;;  %v4191_v45 = vor.u32 %v4616_v38, %v4188_v41  ;;  %v4606_v16 = vld [vmem:[%s6669_s1 + $0x1374] sm:$0xf0]  ;;  %v4167_v38 = vor.u32 %v4611_v36, %v4164_v37  ;;  %v4148_v41 = vld [vmem:[%s6669_s1 + $0x1390] sm:$0xf0]  ;;  %v4628_v36 = vld [vmem:[%s6669_s1 + $0x14ac] sm:$0xf0] }
 0x2cd   : > { %v4151_v39 = vor.u32 %v4607_v40, %v4148_v41  ;;  %v4262_v37 = vld [vmem:[%s6669_s1 + $0x15a0] sm:$0xf]  ;;  %v4645_v41 = vld [vmem:[%s6669_s1 + $0x16cc] sm:$0xf0] }
 0x2ce   : > { %v4298_v40 = vld [vmem:[%s6669_s1 + $0x16c0] sm:$0xf] }
 0x2cf   : > { %2608 = vmatpush.bf16.msra.mxu1 %v4163_v48  ;;  %v4599_v48 = vld [vmem:[%s6669_s1 + $0x1344] sm:$0xf] }
 0x2d0   : > { %v1871_v58 = vpop.f32.mrf.mxu0  ;;  %v4119_v54 = vor.u32 %v4599_v48, %v4116_v51  ;;  %v4627_v48 = vld [vmem:[%s6669_s1 + $0x148c] sm:$0xf0]  ;;  %v4294_v51 = vld [vmem:[%s6669_s1 + $0x16a0] sm:$0xf] }
 0x2d3   : > { %2609 = vmatpush.bf16.msra.mxu1 %v4147_v3  ;;  %v4106_v3 = vld [vmem:[%s6669_s1 + $0x1328] sm:$0xf] }
 0x2d8   : > { %v1873_v5 = vpop.f32.mrf.mxu0 }
 0x2d9   : > { %v1904_v7 = vpack.c.bf16 %v1873_v5, %v1871_v58  ;;  %v4155_v5 = vor.u32 %v4610_v0, %v4154_v63  ;;  %v4597_v63 = vld [vmem:[%s6669_s1 + $0x132c] sm:$0xf0]  ;;  %v4595_v0 = vld [vmem:[%s6669_s1 + $0x1324] sm:$0xf] }
 0x2db   : > { %2355 = vmatmul.bf16.vlgmr.msra.gmra.mxu2 %v1904_v7  ;;  %v4605_v7 = vld [vmem:[%s6669_s1 + $0x136c] sm:$0xf0] }
 0x2dc   : > { %2637 = vmatpush.bf16.msrb.mxu2 %v4155_v5 }
 0x2e0   : > { %v1885_v8 = vpop.f32.mrf.mxu1 }
 0x2e8   : > { %v1887_v17 = vpop.f32.mrf.mxu1 }
 0x2e9   : > { %v1901_v18 = vpack.c.bf16 %v1887_v17, %v1885_v8  ;;  %v4604_v17 = vld [vmem:[%s6669_s1 + $0x136c] sm:$0xf] }
 0x2eb   : > { %2313 = vmatmul.bf16.vlgmr.msrb.gmra.mxu3 %v1901_v18 }
 0x2ec   : > { %2648 = vmatpush.bf16.msrb.mxu3 %v4207_v32  ;;  %v4615_v32 = vld [vmem:[%s6669_s1 + $0x13c4] sm:$0xf] }
 0x2ed   : > { %v4183_v35 = vor.u32 %v4615_v32, %v4180_v33 }
 0x2f0   : > { %v1890_v19 = vpop.f32.mrf.mxu1  ;;  %2649 = vmatpush.bf16.msrb.mxu3 %v4191_v45 }
 0x2f4   : > { %2650 = vmatpush.bf16.msrb.mxu3 %v4175_v62  ;;  %v4098_v62 = vld [vmem:[%s6669_s1 + $0x1320] sm:$0xf] }
 0x2f5   : > { %v4099_v1 = vor.u32 %v4597_v63, %v4098_v62 }
 0x2f8   : > { %v1892_v20 = vpop.f32.mrf.mxu1  ;;  %2651 = vmatpush.bf16.msrb.mxu3 %v4159_v10  ;;  %v4082_v10 = vld [vmem:[%s6669_s1 + $0x1300] sm:$0xf] }
 0x2f9   : > { %v1903_v21 = vpack.c.bf16 %v1892_v20, %v1890_v19  ;;  %v4131_v20 = vor.u32 %v4605_v7, %v4130_v6  ;;  %v4107_v6 = vor.u32 %v4598_v4, %v4106_v3  ;;  %v4596_v7 = vld [vmem:[%s6669_s1 + $0x132c] sm:$0xf]  ;;  %v4222_v3 = vld [vmem:[%s6669_s1 + $0x1460] sm:$0xf]  ;;  %v4626_v4 = vld [vmem:[%s6669_s1 + $0x146c] sm:$0xf0] }
 0x2fb   : > { %2341 = vmatmul.bf16.vlgmr.msrb.gmra.mxu1 %v1903_v21  ;;  %v4140_v21 = vld [vmem:[%s6669_s1 + $0x1378] sm:$0xf0] }
 0x2fc   : > { %2610 = vmatpush.bf16.msra.mxu1 %v4131_v20 }
 0x300   : > { %v1895_v22 = vpop.f32.mrf.mxu1 }
 0x308   : > { %v1897_v29 = vpop.f32.mrf.mxu1 }
 0x309   : > { %v1905_v23 = vpack.c.bf16 %v1897_v29, %v1895_v22  ;;  %v4139_v22 = vor.u32 %v4606_v16, %v4138_v15  ;;  %v4084_v16 = vld [vmem:[%s6669_s1 + $0x1310] sm:$0xf0] }
 0x30b   : > { %2369 = vmatmul.bf16.vlgmr.msra.gmra.mxu3 %v1905_v23  ;;  %v4143_v23 = vor.u32 %v4604_v17, %v4140_v21  ;;  %2638 = vmatpush.bf16.msrb.mxu2 %v4139_v22  ;;  %v4090_v17 = vld [vmem:[%s6669_s1 + $0x1308] sm:$0xf]  ;;  %v4592_v21 = vld [vmem:[%s6669_s1 + $0x130c] sm:$0xf]  ;;  %v4092_v22 = vld [vmem:[%s6669_s1 + $0x1318] sm:$0xf0] }
 0x30d   : > { %2652 = vmatpush.bf16.msrb.mxu3 %v4143_v23  ;;  %v4238_v23 = vld [vmem:[%s6669_s1 + $0x14e0] sm:$0xf] }
 0x33e   : > { %v2300_v24 = vpop.f32.mrf.mxu2 }
 0x33f   : > { %v2301_v47 = vadd.f32 %v2300_v24, %v2002_v50 }
 0x346   : > { %v2302_v13 = vpop.f32.mrf.mxu2 }
 0x347   : > { %v2303_v58 = vadd.f32 %v2302_v13, %v2002_v50  ;;  %v4199_v50 = vor.u32 %v4619_v12, %v4196_v27  ;;  %v4266_v27 = vld [vmem:[%s6669_s1 + $0x15c0] sm:$0xf] }
 0x348   : > { %v2328_v31 = vpop.f32.mrf.mxu0 }
 0x350   : > { %v2330_v8 = vpop.f32.mrf.mxu0 }
 0x35e   : > { %v2356_v53 = vpop.f32.mrf.mxu2 }
 0x366   : > { %v2358_v24 = vpop.f32.mrf.mxu2 }
 0x36e   : > { %v2314_v2 = vpop.f32.mrf.mxu3 }
 0x36f   : > { %v2315_v61 = vadd.f32 %v2314_v2, %v2301_v47  ;;  %v4601_v47 = vld [vmem:[%s6669_s1 + $0x134c] sm:$0xf0] }
 0x370   : > { %v4115_v49 = vor.u32 %v4601_v47, %v4114_v46  ;;  %v4226_v47 = vld [vmem:[%s6669_s1 + $0x1480] sm:$0xf] }
 0x371   : > { %v2329_v9 = vadd.f32 %v2328_v31, %v2315_v61  ;;  %v4227_v62 = vor.u32 %v4627_v48, %v4226_v47  ;;  %v4274_v47 = vld [vmem:[%s6669_s1 + $0x1600] sm:$0xf]  ;;  %v4639_v48 = vld [vmem:[%s6669_s1 + $0x160c] sm:$0xf0] }
 0x372   : > { %2611 = vmatpush.bf16.msra.mxu1 %v4115_v49 }
 0x376   : > { %v2316_v44 = vpop.f32.mrf.mxu3  ;;  %2612 = vmatpush.bf16.msra.mxu1 %v4099_v1 }
 0x377   : > { %v2317_v43 = vadd.f32 %v2316_v44, %v2303_v58  ;;  %v4132_v44 = vld [vmem:[%s6669_s1 + $0x1370] sm:$0xf0]  ;;  %v4124_v58 = vld [vmem:[%s6669_s1 + $0x1358] sm:$0xf0] }
 0x378   : > { %v2342_v34 = vpop.f32.mrf.mxu1  ;;  %v4135_v45 = vor.u32 %v4603_v42, %v4132_v44  ;;  %v4127_v61 = vor.u32 %v4600_v57, %v4124_v58  ;;  %v4330_v42 = vld [vmem:[%s6669_s1 + $0x17c0] sm:$0xf]  ;;  %v4653_v44 = vld [vmem:[%s6669_s1 + $0x17cc] sm:$0xf0] }
 0x379   : > { %v2343_v18 = vadd.f32 %v2342_v34, %v2329_v9  ;;  %v2331_v19 = vadd.f32 %v2330_v8, %v2317_v43  ;;  %v4077_v34 = vor.u32 %v4590_v30, %v4076_v60  ;;  %v4100_v43 = vld [vmem:[%s6669_s1 + $0x1330] sm:$0xf0]  ;;  %v4108_v8 = vld [vmem:[%s6669_s1 + $0x1338] sm:$0xf0]  ;;  %v4646_v30 = vld [vmem:[%s6669_s1 + $0x16ec] sm:$0xf0]  ;;  %v4331_v46 = vor.u32 %v4653_v44, %v4330_v42 }
 0x37a   : > { %2653 = vmatpush.bf16.msrb.mxu3 %v4127_v61  ;;  %v4103_v5 = vor.u32 %v4595_v0, %v4100_v43  ;;  %v4111_v9 = vor.u32 %v4596_v7, %v4108_v8  ;;  %v4652_v57 = vld [vmem:[%s6669_s1 + $0x17ac] sm:$0xf0]  ;;  %v4310_v42 = vld [vmem:[%s6669_s1 + $0x1720] sm:$0xf] }
 0x37b   : > { %v2357_v2 = vadd.f32 %v2356_v53, %v2343_v18  ;;  %v4602_v53 = vld [vmem:[%s6669_s1 + $0x1354] sm:$0xf0]  ;;  %v4634_v7 = vld [vmem:[%s6669_s1 + $0x156c] sm:$0xf0] }
 0x37c   : > { %v4123_v56 = vor.u32 %v4602_v53, %v4122_v52  ;;  %v4594_v18 = vld [vmem:[%s6669_s1 + $0x1314] sm:$0xf0]  ;;  %v4644_v52 = vld [vmem:[%s6669_s1 + $0x16ac] sm:$0xf0]  ;;  %v4326_v53 = vld [vmem:[%s6669_s1 + $0x17a0] sm:$0xf] }
 0x37d   : > { %v4091_v20 = vor.u32 %v4594_v18, %v4090_v17  ;;  %v4295_v58 = vor.u32 %v4644_v52, %v4294_v51  ;;  %v4327_v61 = vor.u32 %v4652_v57, %v4326_v53  ;;  %v4218_v17 = vld [vmem:[%s6669_s1 + $0x1440] sm:$0xf]  ;;  %v4625_v18 = vld [vmem:[%s6669_s1 + $0x144c] sm:$0xf0]  ;;  %v4275_v51 = vor.u32 %v4639_v48, %v4274_v47 }
 0x37e   : > { %2639 = vmatpush.bf16.msrb.mxu2 %v4123_v56  ;;  %2654 = vmatpush.bf16.msrb.mxu3 %v4111_v9  ;;  %v4635_v56 = vld [vmem:[%s6669_s1 + $0x158c] sm:$0xf0]  ;;  %v4290_v9 = vld [vmem:[%s6669_s1 + $0x1680] sm:$0xf] }
 0x37f   : > { %v4647_v52 = vld [vmem:[%s6669_s1 + $0x170c] sm:$0xf0] }
 0x380   : > { %v2344_v11 = vpop.f32.mrf.mxu1 }
 0x381   : > { %v2345_v29 = vadd.f32 %v2344_v11, %v2331_v19  ;;  %v4593_v11 = vld [vmem:[%s6669_s1 + $0x130c] sm:$0xf0] }
 0x382   : > { %2640 = vmatpush.bf16.msrb.mxu2 %v4107_v6  ;;  %v4083_v15 = vor.u32 %v4593_v11, %v4082_v10  ;;  %v4223_v6 = vor.u32 %v4626_v4, %v4222_v3  ;;  %v4643_v10 = vld [vmem:[%s6669_s1 + $0x168c] sm:$0xf0] }
 0x383   : > { %v2359_v13 = vadd.f32 %v2358_v24, %v2345_v29  ;;  %v4095_v29 = vor.u32 %v4592_v21, %v4092_v22  ;;  %v4630_v24 = vld [vmem:[%s6669_s1 + $0x14ec] sm:$0xf0]  ;;  %v4291_v11 = vor.u32 %v4643_v10, %v4290_v9 }
 0x384   : > { %2613 = vmatpush.bf16.msra.mxu1 %v4083_v15  ;;  %v4651_v15 = vld [vmem:[%s6669_s1 + $0x178c] sm:$0xf0] }
 0x385   : > { %2655 = vmatpush.bf16.msrb.mxu3 %v4095_v29  ;;  %v4633_v21 = vld [vmem:[%s6669_s1 + $0x154c] sm:$0xf0]  ;;  %v4286_v29 = vld [vmem:[%s6669_s1 + $0x1660] sm:$0xf] }
 0x386   : > { %2641 = vmatpush.bf16.msrb.mxu2 %v4091_v20  ;;  %v4219_v20 = vor.u32 %v4625_v18, %v4218_v17 }
 0x38e   : > { %v2370_v14 = vpop.f32.mrf.mxu3 }
 0x38f   : > { %v2371_v25 = vadd.f32 %v2370_v14, %v2357_v2  ;;  %v4591_v14 = vld [vmem:[%s6669_s1 + $0x1304] sm:$0xf]  ;;  %v4270_v2 = vld [vmem:[%s6669_s1 + $0x15e0] sm:$0xf] }
 0x390   : > { %v4087_v19 = vor.u32 %v4591_v14, %v4084_v16  ;;  %v4322_v14 = vld [vmem:[%s6669_s1 + $0x1780] sm:$0xf] }
 0x391   : > { %v2375_v55 = vmax.f32 %v2371_v25, 0.0  ;;  %v4638_v25 = vld [vmem:[%s6669_s1 + $0x15ec] sm:$0xf0]  ;;  %v4323_v16 = vor.u32 %v4651_v15, %v4322_v14 }
 0x392   : > { %v4271_v12 = vor.u32 %v4638_v25, %v4270_v2 }
 0x396   : > { %v2372_v59 = vpop.f32.mrf.mxu3 }
 0x397   : > { %v2373_v26 = vadd.f32 %v2372_v59, %v2359_v13  ;;  %v4239_v13 = vor.u32 %v4630_v24, %v4238_v23  ;;  %v4234_v59 = vld [vmem:[%s6669_s1 + $0x14c0] sm:$0xf]  ;;  %v4642_v23 = vld [vmem:[%s6669_s1 + $0x166c] sm:$0xf0] }
 0x398   : > { %v4318_v24 = vld [vmem:[%s6669_s1 + $0x1760] sm:$0xf]  ;;  %v4287_v2 = vor.u32 %v4642_v23, %v4286_v29 }
 0x399   : > { %v2376_v28 = vmax.f32 %v2373_v26, 0.0  ;;  %v4629_v26 = vld [vmem:[%s6669_s1 + $0x14cc] sm:$0xf0]  ;;  %2931 = vmatpush.bf16.msrb.mxu1 %v4239_v13 }
 0x39a   : > { %v4235_v60 = vor.u32 %v4629_v26, %v4234_v59  ;;  %v4650_v13 = vld [vmem:[%s6669_s1 + $0x176c] sm:$0xf0]  ;;  %v4214_v59 = vld [vmem:[%s6669_s1 + $0x1420] sm:$0xf] }
 0x39b   : > { %v2377_v31 = vpack.c.bf16 %v2376_v28, %v2375_v55  ;;  %v4637_v55 = vld [vmem:[%s6669_s1 + $0x15cc] sm:$0xf0]  ;;  %v4302_v28 = vld [vmem:[%s6669_s1 + $0x16e0] sm:$0xf]  ;;  %v4319_v25 = vor.u32 %v4650_v13, %v4318_v24 }
 0x39c   : > { %v4267_v32 = vor.u32 %v4637_v55, %v4266_v27  ;;  %v4303_v33 = vor.u32 %v4646_v30, %v4302_v28  ;;  %v4624_v26 = vld [vmem:[%s6669_s1 + $0x142c] sm:$0xf0]  ;;  %v4246_v27 = vld [vmem:[%s6669_s1 + $0x1520] sm:$0xf] }
 0x39d   : > { %2395 = vmatpush.bf16.msra.mxu0 %v2377_v31  ;;  %v4654_v31 = vld [vmem:[%s6669_s1 + $0x17ec] sm:$0xf0]  ;;  %2932 = vmatpush.bf16.msrb.mxu1 %v4235_v60  ;;  %v4282_v60 = vld [vmem:[%s6669_s1 + $0x1640] sm:$0xf] }
 0x39e   : > { %2959 = vmatpush.bf16.msra.mxu2 %v4303_v33  ;;  %v4632_v55 = vld [vmem:[%s6669_s1 + $0x152c] sm:$0xf0] }
 0x39f   : > { %v4247_v28 = vor.u32 %v4632_v55, %v4246_v27  ;;  %v4641_v30 = vld [vmem:[%s6669_s1 + $0x164c] sm:$0xf0] }
 0x3a0   : > { %4078 = vmatmul.msk.bf16.vlgmr.msra.gmra.mxu0 %vm738_vm0, %v4077_v34 }
 0x3a1   : > { %2620 = vmatpush.bf16.msrb.mxu0 %v4199_v50  ;;  %v4334_v50 = vld [vmem:[%s6669_s1 + $0x17e0] sm:$0xf] }
 0x3a2   : > { %v4335_v34 = vor.u32 %v4654_v31, %v4334_v50  ;;  %v4314_v50 = vld [vmem:[%s6669_s1 + $0x1740] sm:$0xf]  ;;  %v4283_v31 = vor.u32 %v4641_v30, %v4282_v60 }
 0x3a4   : > { %2973 = vmatpush.bf16.msra.mxu3 %v4335_v34  ;;  %v4210_v34 = vld [vmem:[%s6669_s1 + $0x1400] sm:$0xf] }
 0x3a5   : > { %2621 = vmatpush.bf16.msrb.mxu0 %v4183_v35  ;;  %v4230_v35 = vld [vmem:[%s6669_s1 + $0x14a0] sm:$0xf] }
 0x3a8   : > { %2974 = vmatpush.bf16.msra.mxu3 %v4331_v46 }
 0x3a9   : > { %2622 = vmatpush.bf16.msrb.mxu0 %v4167_v38  ;;  %v4636_v38 = vld [vmem:[%s6669_s1 + $0x15ac] sm:$0xf0] }
 0x3aa   : > { %v4263_v49 = vor.u32 %v4636_v38, %v4262_v37  ;;  %v4631_v38 = vld [vmem:[%s6669_s1 + $0x150c] sm:$0xf0] }
 0x3ac   : > { %2975 = vmatpush.bf16.msra.mxu3 %v4327_v61 }
 0x3ad   : > { %2623 = vmatpush.bf16.msrb.mxu0 %v4151_v39  ;;  %v4299_v39 = vor.u32 %v4645_v41, %v4298_v40  ;;  %v4278_v41 = vld [vmem:[%s6669_s1 + $0x1620] sm:$0xf] }
 0x3af   : > { %2960 = vmatpush.bf16.msra.mxu2 %v4299_v39  ;;  %v4640_v39 = vld [vmem:[%s6669_s1 + $0x162c] sm:$0xf0] }
 0x3b0   : > { %2976 = vmatpush.bf16.msra.mxu3 %v4323_v16  ;;  %v4279_v44 = vor.u32 %v4640_v39, %v4278_v41 }
 0x3b1   : > { %2624 = vmatpush.bf16.msrb.mxu0 %v4135_v45  ;;  %v4231_v45 = vor.u32 %v4628_v36, %v4230_v35  ;;  %v4623_v35 = vld [vmem:[%s6669_s1 + $0x140c] sm:$0xf0]  ;;  %v4242_v36 = vld [vmem:[%s6669_s1 + $0x1500] sm:$0xf] }
 0x3b2   : > { %v4211_v37 = vor.u32 %v4623_v35, %v4210_v34  ;;  %v4243_v40 = vor.u32 %v4631_v38, %v4242_v36 }
 0x3b3   : > { %2933 = vmatpush.bf16.msrb.mxu1 %v4231_v45  ;;  %2961 = vmatpush.bf16.msra.mxu2 %v4295_v58  ;;  %v4648_v45 = vld [vmem:[%s6669_s1 + $0x172c] sm:$0xf0] }
 0x3b4   : > { %2977 = vmatpush.bf16.msra.mxu3 %v4319_v25  ;;  %v4311_v46 = vor.u32 %v4648_v45, %v4310_v42 }
 0x3b5   : > { %2625 = vmatpush.bf16.msrb.mxu0 %v4119_v54  ;;  %v4258_v54 = vld [vmem:[%s6669_s1 + $0x1580] sm:$0xf] }
 0x3b6   : > { %v4259_v63 = vor.u32 %v4635_v56, %v4258_v54  ;;  %v4079_v54 = vld [vmem:[%s6670_s2 + $0x3] ss:$8 sm:$0xf] }
 0x3b7   : > { %2934 = vmatpush.bf16.msrb.mxu1 %v4227_v62  ;;  %2962 = vmatpush.bf16.msra.mxu2 %v4291_v11  ;;  %v2438_v58 = vperm.slane %v4079_v54, 0  ;;  %v2439_v61 = vperm.slane %v4079_v54, 1 }
 0x3b9   : > { %2626 = vmatpush.bf16.msrb.mxu0 %v4103_v5  ;;  %v4254_v5 = vld [vmem:[%s6669_s1 + $0x1560] sm:$0xf] }
 0x3ba   : > { %v4255_v8 = vor.u32 %v4634_v7, %v4254_v5  ;;  %v2441_v7 = vperm.slane %v4079_v54, 3 }
 0x3bb   : > { %2935 = vmatpush.bf16.msrb.mxu1 %v4223_v6  ;;  %2963 = vmatpush.bf16.msra.mxu2 %v4287_v2  ;;  %v2440_v6 = vperm.slane %v4079_v54, 2 }
 0x3bd   : > { %2627 = vmatpush.bf16.msrb.mxu0 %v4087_v19  ;;  %v4250_v19 = vld [vmem:[%s6669_s1 + $0x1540] sm:$0xf] }
 0x3be   : > { %v4251_v22 = vor.u32 %v4633_v21, %v4250_v19 }
 0x3bf   : > { %2936 = vmatpush.bf16.msrb.mxu1 %v4219_v20  ;;  %2964 = vmatpush.bf16.msra.mxu2 %v4283_v31 }
 0x3c1   : > { %2945 = vmatpush.bf16.msra.mxu0 %v4271_v12  ;;  %v4215_v12 = vor.u32 %v4624_v26, %v4214_v59  ;;  %v2738_v59 = vld [vmem:[%s6670_s2 + $0x4] ss:$0 sm:$0xff] }
 0x3c3   : > { %2937 = vmatpush.bf16.msrb.mxu1 %v4215_v12  ;;  %2965 = vmatpush.bf16.msra.mxu2 %v4279_v44 }
 0x3c5   : > { %2946 = vmatpush.bf16.msra.mxu0 %v4267_v32  ;;  %v4649_v32 = vld [vmem:[%s6669_s1 + $0x174c] sm:$0xf0] }
 0x3c6   : > { %v4315_v33 = vor.u32 %v4649_v32, %v4314_v50 }
 0x3c7   : > { %2938 = vmatpush.bf16.msrb.mxu1 %v4211_v37  ;;  %2966 = vmatpush.bf16.msra.mxu2 %v4275_v51 }
 0x3c8   : > { %2978 = vmatpush.bf16.msra.mxu3 %v4315_v33 }
 0x3c9   : > { %2947 = vmatpush.bf16.msra.mxu0 %v4263_v49  ;;  %v4306_v49 = vld [vmem:[%s6669_s1 + $0x1700] sm:$0xf] }
 0x3ca   : > { %v4307_v53 = vor.u32 %v4647_v52, %v4306_v49 }
 0x3cc   : > { %2979 = vmatpush.bf16.msra.mxu3 %v4311_v46 }
 0x3cd   : > { %2948 = vmatpush.bf16.msra.mxu0 %v4259_v63 }
 0x3d0   : > { %2980 = vmatpush.bf16.msra.mxu3 %v4307_v53 }
 0x3d1   : > { %2949 = vmatpush.bf16.msra.mxu0 %v4255_v8 }
 0x3d5   : > { %2950 = vmatpush.bf16.msra.mxu0 %v4251_v22 }
 0x3d9   : > { %2951 = vmatpush.bf16.msra.mxu0 %v4247_v28 }
 0x3dd   : > { %2952 = vmatpush.bf16.msra.mxu0 %v4243_v40 }
 0x41d   : > { %v2397_v0 = vpop.f32.mrf.mxu0 }
 0x425   : > { %v2399_v1 = vpop.f32.mrf.mxu0 }
 0x426   : > { %v2402_v43 = vpack.c.bf16 %v2399_v1, %v2397_v0 }
 0x428   : > { %2614 = vmatmul.bf16.vlgmr.msra.gmra.mxu1 %v2402_v43  ;;  %2628 = vmatmul.bf16.vlgmr.msrb.gmra.mxu0 %v2402_v43 }
 0x429   : > { %2642 = vmatmul.bf16.vlgmr.msrb.gmra.mxu2 %v2402_v43  ;;  %2656 = vmatmul.bf16.vlgmr.msrb.gmra.mxu3 %v2402_v43 }
 0x4a5   : > { %v2615_v56 = vpop.f32.mrf.mxu1  ;;  %v2629_v57 = vpop.f32.mrf.mxu0 }
 0x4a6   : > { %v2616_v62 = vadd.f32 %v2615_v56, %v2438_v58  ;;  %v2630_v63 = vadd.f32 %v2629_v57, %v2439_v61 }
 0x4a8   : > { %v2662_v8 = vmax.f32 %v2616_v62, 0.0  ;;  %v2663_v9 = vmax.f32 %v2630_v63, 0.0 }
 0x4ac   : > { %v2643_v0 = vpop.f32.mrf.mxu2  ;;  %v2657_v1 = vpop.f32.mrf.mxu3 }
 0x4ad   : > { %v2617_v43 = vpop.f32.mrf.mxu1  ;;  %v2631_v3 = vpop.f32.mrf.mxu0  ;;  %v2644_v16 = vadd.f32 %v2643_v0, %v2440_v6  ;;  %v2658_v17 = vadd.f32 %v2657_v1, %v2441_v7 }
 0x4ae   : > { %v2618_v4 = vadd.f32 %v2617_v43, %v2438_v58  ;;  %v2632_v5 = vadd.f32 %v2631_v3, %v2439_v61 }
 0x4af   : > { %v2664_v22 = vmax.f32 %v2644_v16, 0.0  ;;  %v2665_v29 = vmax.f32 %v2658_v17, 0.0 }
 0x4b0   : > { %v2666_v10 = vmax.f32 %v2618_v4, 0.0  ;;  %v2667_v11 = vmax.f32 %v2632_v5, 0.0 }
 0x4b2   : > { %v2670_v14 = vpack.c.bf16 %v2666_v10, %v2662_v8  ;;  %v2671_v15 = vpack.c.bf16 %v2667_v11, %v2663_v9 }
 0x4b4   : > { %v2645_v18 = vpop.f32.mrf.mxu2  ;;  %v2659_v19 = vpop.f32.mrf.mxu3  ;;  %2939 = vmatmul.bf16.vlgmr.msrb.gmra.mxu1 %v2670_v14  ;;  %2953 = vmatmul.bf16.vlgmr.msra.gmra.mxu0 %v2671_v15 }
 0x4b5   : > { %v2646_v20 = vadd.f32 %v2645_v18, %v2440_v6  ;;  %v2660_v21 = vadd.f32 %v2659_v19, %v2441_v7 }
 0x4b7   : > { %v2668_v23 = vmax.f32 %v2646_v20, 0.0  ;;  %v2669_v24 = vmax.f32 %v2660_v21, 0.0 }
 0x4b9   : > { %v2672_v2 = vpack.c.bf16 %v2668_v23, %v2664_v22  ;;  %v2673_v13 = vpack.c.bf16 %v2669_v24, %v2665_v29 }
 0x4bb   : > { %2967 = vmatmul.bf16.vlgmr.msra.gmra.mxu2 %v2672_v2  ;;  %2981 = vmatmul.bf16.vlgmr.msra.gmra.mxu3 %v2673_v13 }
 0x531   : > { %v2940_v25 = vpop.f32.mrf.mxu1  ;;  %v2954_v12 = vpop.f32.mrf.mxu0 }
 0x532   : > { %v2941_v26 = vadd.f32 %v2940_v25, %v2738_v59 }
 0x534   : > { %v2955_v27 = vadd.f32 %v2954_v12, %v2941_v26 }
 0x539   : > { %v2942_v55 = vpop.f32.mrf.mxu1  ;;  %v2956_v32 = vpop.f32.mrf.mxu0 }
 0x53a   : > { %v2943_v50 = vadd.f32 %v2942_v55, %v2738_v59 }
 0x53c   : > { %v2957_v33 = vadd.f32 %v2956_v32, %v2943_v50 }
 0x53e   : > { %v2968_v28 = vpop.f32.mrf.mxu2  ;;  %v2982_v60 = vpop.f32.mrf.mxu3 }
 0x53f   : > { %v2969_v30 = vadd.f32 %v2968_v28, %v2955_v27 }
 0x541   : > { %v2983_v31 = vadd.f32 %v2982_v60, %v2969_v30 }
 0x543   : > { %2987 = vst [vmem:[%s175_s29] sm:$0xff] %v2983_v31 }
 0x546   : > { %v2970_v34 = vpop.f32.mrf.mxu2  ;;  %v2984_v36 = vpop.f32.mrf.mxu3 }
 0x547   : > { %v2971_v35 = vadd.f32 %v2970_v34, %v2957_v33 }
 0x549   : > { %v2985_v37 = vadd.f32 %v2984_v36, %v2971_v35 }
 0x54b   : > { %2988 = vst [vmem:[%s175_s29 + $0x8] sm:$0xff] %v2985_v37 }
 0x54c PF: > { %s13_s12 = sadd.s32 1, %s4669_s12  }
 0x54d   : > { %p10_p4 = scmp.ge.s32.totalorder %s13_s12, 4  }
 0x54f   :  { %12 = sbr.rel (!%p10_p4) target bundleno = 1 (0x1), region = 64 }

</bundles_post_ra>
